<compile_context>
chip_gen: v7x
topology: tpu7x:2x2x1
jax: 0.10.0
libtpu: 0.0.40
codegen_flags: <defaults>
</compile_context>

<pallas_src>
import functools

import jax
import jax.numpy as jnp
from jax.experimental import pallas as pl
from jax.experimental.pallas import tpu as pltpu

LN_EPS = 1e-5


# ------------------------------ kernel ------------------------------

def _lanenet_kernel(feats_ref, wp_ref, wm_ref, vec_ref, out_ref, *, n_pts):
    tb, h = out_ref.shape          # lanes in this tile, hidden size
    m = feats_ref.shape[0]         # total point rows in this tile (tb * n_pts)

    def mm(x, w):
        # Weights arrive host-pre-cast for the bf16 MXU path; only the activation
        # operand is cast in-kernel.  Accumulate in f32 on the MXU.
        if w.dtype != jnp.float32:
            x = x.astype(w.dtype)
        return jnp.dot(x, w, preferred_element_type=jnp.float32)

    def ln(x, g, b):
        # Single-pass LayerNorm: var = E[x^2] - mu^2, statistics in f32.
        mu = jnp.mean(x, axis=-1, keepdims=True)
        ms = jnp.mean(x * x, axis=-1, keepdims=True)
        var = jnp.maximum(ms - mu * mu, 0.0)
        return (x - mu) * jax.lax.rsqrt(var + LN_EPS) * g + b

    def lin_ln_relu(x, w, bias, g, be):
        return jnp.maximum(ln(mm(x, w) + bias, g, be), 0.0)

    def aggre_block(x_inp, mo, vo, aggre_out):
        v = lambda i: vec_ref[vo + i]
        # fc1: (Linear, LN, ReLU) x 2 on all TILE_B*N rows at once.
        x = lin_ln_relu(x_inp, wm_ref[mo + 0], v(0), v(1), v(2))
        x = lin_ln_relu(x, wm_ref[mo + 1], v(3), v(4), v(5))
        # Per-lane max-pool, then ONE batched (TB,H)@(H,H) matmul for the pooled
        # branch of fc2's Linear(2H->H) (split-weight == concat + matmul).
        x_aggre = jnp.max(x.reshape(tb, n_pts, h), axis=1)          # (TB, H)
        y = mm(x_aggre, wm_ref[mo + 3])                             # (TB, H)
        # Add the pooled branch via broadcast in the 3-D view (no materialized
        # broadcast_to + reshape round-trip).
        hid = mm(x, wm_ref[mo + 2]).reshape(tb, n_pts, h) + y[:, None, :] + v(6)
        hid = jnp.maximum(ln(hid, v(7), v(8)), 0.0).reshape(m, h)
        hid = lin_ln_relu(hid, wm_ref[mo + 4], v(9), v(10), v(11))
        out = ln(x_inp + hid, v(12), v(13))
        if aggre_out:
            return jnp.max(out.reshape(tb, n_pts, h), axis=1)       # (TB, H)
        return out                                                  # (M, H)

    # proj: Linear(F->H) + LN + ReLU  (feats already arrive as a 2-D (M,F) block)
    x = lin_ln_relu(feats_ref[...], wp_ref[...], vec_ref[0], vec_ref[1], vec_ref[2])
    # aggre1 (aggre_out=False): mats 0..4, vecs 3..16
    x = aggre_block(x, mo=0, vo=3, aggre_out=False)
    # aggre2 (aggre_out=True):  mats 5..9, vecs 17..30
    x = aggre_block(x, mo=5, vo=17, aggre_out=True)

    out_ref[...] = x.astype(out_ref.dtype)                          # (TB, H)


# ------------------------------ wrapper ------------------------------

def _round_up(x, m):
    return -(-x // m) * m


def lanenet_forward(feats, wp, wm, vec, *, lanes_per_tile=None,
                    matmul_dtype=jnp.float32, out_dtype=jnp.float32):
    """LaneNet forward. feats: (B, N, F) -> (B, H).

    Note: for B == 1 the torch module's .squeeze() would also drop the batch
    dimension; callers wanting that should squeeze the returned (1, H).
    """
    B, N, F = feats.shape
    H = wp.shape[1]

    # Host-side one-time weight cast for the bf16 MXU path (v6e/v7x lever).
    # Keep f32 default on v5e (no bf16 VPU; avoid pure-overhead packing).
    if matmul_dtype != jnp.float32:
        wp = wp.astype(matmul_dtype)
        wm = wm.astype(matmul_dtype)

    # Sublane granularity for the (lanes, H) output block.
    sub = 16 if jnp.dtype(out_dtype).itemsize < 4 else 8

    if lanes_per_tile is None:
        # Target ~2048 activation rows per grid step (M = lanes_per_tile * N).
        target = max(sub, ((2048 // max(N, 1)) // sub) * sub)
        if B < 16:
            lanes_per_tile = min(B, target)            # tiny batch: 1 tile, no pad
        else:
            # Keep >= 2 tiles so the "parallel" axis can shard over v7x's 2 TCs.
            half = _round_up(-(-B // 2), sub)
            lanes_per_tile = max(sub, min(target, half))

    num_tiles = pl.cdiv(B, lanes_per_tile)
    b_pad = num_tiles * lanes_per_tile
    if b_pad != B:
        # Zero padding is safe: padded rows give var=0 -> rsqrt(eps), finite,
        # and are sliced off below.
        feats = jnp.pad(feats, ((0, b_pad - B), (0, 0), (0, 0)))

    # Flatten lanes*points on the host so the kernel gets a 2-D block directly
    # (kills the in-kernel input reshape / relayout).
    feats2 = feats.reshape(b_pad * N, F)
    tile_m = lanes_per_tile * N

    # Advisory cost so XLA doesn't schedule this as a heavy op.
    flops = 2 * b_pad * N * H * (F + 8 * H) + 4 * b_pad * H * H
    cost = pl.CostEstimate(
        flops=int(flops),
        transcendentals=int(11 * b_pad * N),  # one rsqrt per LayerNorm row
        bytes_accessed=int(4 * (b_pad * N * F + wp.size + wm.size + vec.size
                                + b_pad * H)),
    )

    out = pl.pallas_call(
        functools.partial(_lanenet_kernel, n_pts=N),
        out_shape=jax.ShapeDtypeStruct((b_pad, H), out_dtype),
        grid_spec=pltpu.PrefetchScalarGridSpec(
            num_scalar_prefetch=0,
            grid=(num_tiles,),
            in_specs=[
                pl.BlockSpec((tile_m, F), lambda t: (t, 0)),
                # Weights: constant index maps -> fetched once, VMEM-resident
                # across lane tiles.  (pl.Buffered(1) would drop the second
                # pipeline copy; left at default for portability.)
                pl.BlockSpec((F, H), lambda t: (0, 0)),
                pl.BlockSpec((10, H, H), lambda t: (0, 0, 0)),
                pl.BlockSpec((31, H), lambda t: (0, 0)),
            ],
            out_specs=pl.BlockSpec((lanes_per_tile, H), lambda t: (t, 0)),
        ),
        compiler_params=pltpu.CompilerParams(
            # Lane tiles are independent -> shard across TensorCores (v7x).
            dimension_semantics=("parallel",),
            # Headroom for ~2048-row tiles on v5e's 16 MiB scoped default;
            # still well under v7x's 64 MiB physical VMEM.
            vmem_limit_bytes=32 * 1024 * 1024),
        cost_estimate=cost,
    )(feats2, wp, wm, vec)
    return out[:B]                 # (B, H)


# ------------------------------ pure-JAX reference ------------------------------

def _ref_lanenet(feats, wp, wm, vec, matmul_dtype=jnp.float32):
    def mm(x, w):
        if matmul_dtype != jnp.float32:
            x = x.astype(matmul_dtype)
            w = w.astype(matmul_dtype)
        return jnp.dot(x, w, preferred_element_type=jnp.float32)

    def ln(x, g, b):  # two-pass (torch-style) LayerNorm
        mu = jnp.mean(x, axis=-1, keepdims=True)
        var = jnp.mean((x - mu) ** 2, axis=-1, keepdims=True)
        return (x - mu) * jax.lax.rsqrt(var + LN_EPS) * g + b

    def llr(x, w, b, g, be):
        return jnp.maximum(ln(mm(x, w) + b, g, be), 0.0)

    def aggre(x_inp, mo, vo, aggre_out):
        x = llr(x_inp, wm[mo], vec[vo], vec[vo + 1], vec[vo + 2])
        x = llr(x, wm[mo + 1], vec[vo + 3], vec[vo + 4], vec[vo + 5])
        x_ag = jnp.max(x, axis=1, keepdims=True)
        xc = jnp.concatenate([x, jnp.broadcast_to(x_ag, x.shape)], axis=-1)
        w_cat = jnp.concatenate([wm[mo + 2], wm[mo + 3]], axis=0)   # (2H, H)
        h = jnp.maximum(ln(mm(xc, w_cat) + vec[vo + 6], vec[vo + 7],
                           vec[vo + 8]), 0.0)
        h = llr(h, wm[mo + 4], vec[vo + 9], vec[vo + 10], vec[vo + 11])
        out = ln(x_inp + h, vec[vo + 12], vec[vo + 13])
        if aggre_out:
            return jnp.max(out, axis=1)
        return out

    x = llr(feats, wp, vec[0], vec[1], vec[2])
    x = aggre(x, 0, 3, False)
    x = aggre(x, 5, 17, True)
    return x


# ------------------------------ main ------------------------------

if __name__ == "__main__":
    def make_params(key, F, H):
        k_wp, k_wm, k_vec = jax.random.split(key, 3)
        wp = jax.random.normal(k_wp, (F, H), dtype=jnp.float32) * 0.1
        wm = jax.random.normal(k_wm, (10, H, H), dtype=jnp.float32) * 0.1
        # Vector params [31, H]:
        #   idx 0..2   proj:  bias, ln_gamma, ln_beta
        #   per block (offsets 3 and 17), 14 each:
        #     b1,g1,be1, b2,g2,be2, b3,g3,be3, b4,g4,be4, gnorm,bnorm
        biases = jax.random.normal(k_vec, (31, H), dtype=jnp.float32) * 0.05
        gamma_rows = jnp.array([1, 4, 7, 10, 13, 15, 18, 21, 24, 27, 29])
        beta_rows = jnp.array([2, 5, 8, 11, 14, 16, 19, 22, 25, 28, 30])
        vec = biases.at[gamma_rows].set(1.0).at[beta_rows].set(0.0)
        return wp, wm, vec

    root = jax.random.PRNGKey(0)
    k1, k2, k3, k4 = jax.random.split(root, 4)

    # Case 1: tiny shapes (single tile, no padding), scaled-down hidden size.
    B, N, F, H = 2, 8, 10, 32
    feats = jax.random.normal(k1, (B, N, F), dtype=jnp.float32)
    wp, wm, vec = make_params(k2, F, H)
    out = jax.block_until_ready(lanenet_forward(feats, wp, wm, vec))
    ref = _ref_lanenet(feats, wp, wm, vec)
    assert out.shape == (B, H)
    assert jnp.allclose(out, ref, atol=5e-4, rtol=5e-4), (
        float(jnp.max(jnp.abs(out - ref))))

    # Case 2: multi-tile path (2 grid steps, padded batch) at production H=128.
    B2, N2, F2, H2 = 20, 8, 10, 128
    feats2 = jax.random.normal(k3, (B2, N2, F2), dtype=jnp.float32)
    wp2, wm2, vec2 = make_params(k4, F2, H2)
    out2 = jax.block_until_ready(lanenet_forward(feats2, wp2, wm2, vec2))
    ref2 = _ref_lanenet(feats2, wp2, wm2, vec2)
    assert out2.shape == (B2, H2)
    assert jnp.allclose(out2, ref2, atol=5e-4, rtol=5e-4), (
        float(jnp.max(jnp.abs(out2 - ref2))))

    # bf16 MXU-operand path (weights pre-cast on the host), vs a bf16 reference.
    out_bf = jax.block_until_ready(
        lanenet_forward(feats2, wp2, wm2, vec2, matmul_dtype=jnp.bfloat16))
    ref_bf = _ref_lanenet(feats2, wp2, wm2, vec2, matmul_dtype=jnp.bfloat16)
    assert jnp.allclose(out_bf, ref_bf, atol=5e-3, rtol=5e-3), (
        float(jnp.max(jnp.abs(out_bf - ref_bf))))

    print("KERNEL_OK")
</pallas_src>

<mosaic_0001>
module attributes {stable_mosaic.version = 11 : i64} {
  func.func @_lanenet_kernel(%arg0: i32, %arg1: memref<16x10xf32, #tpu.memory_space<vmem>>, %arg2: memref<10x32xf32, #tpu.memory_space<vmem>>, %arg3: memref<10x32x32xf32, #tpu.memory_space<vmem>>, %arg4: memref<31x32xf32, #tpu.memory_space<vmem>>, %arg5: memref<2x32xf32, #tpu.memory_space<vmem>>) attributes {dimension_semantics = [#tpu.dimension_semantics<parallel>], iteration_bounds = array<i64: 1>, scalar_prefetch = 0 : i64, scratch_operands = 0 : i64, tpu.core_type = #tpu.core_type<tc>, window_params = [{transform_indices = @transform_0, window_bounds = array<i64: 16, 10>}, {pipeline_mode = #tpu.pipeline_mode<synchronous>, transform_indices = @transform_1, window_bounds = array<i64: 10, 32>}, {pipeline_mode = #tpu.pipeline_mode<synchronous>, transform_indices = @transform_2, window_bounds = array<i64: 10, 32, 32>}, {pipeline_mode = #tpu.pipeline_mode<synchronous>, transform_indices = @transform_3, window_bounds = array<i64: 31, 32>}, {transform_indices = @transform_4, window_bounds = array<i64: 2, 32>}]} {
    %c0 = arith.constant 0 : index
    %c0_0 = arith.constant 0 : index
    %0 = vector.load %arg1[%c0, %c0_0] : memref<16x10xf32, #tpu.memory_space<vmem>>, vector<16x10xf32>
    %c0_1 = arith.constant 0 : index
    %c0_2 = arith.constant 0 : index
    %1 = vector.load %arg2[%c0_1, %c0_2] : memref<10x32xf32, #tpu.memory_space<vmem>>, vector<10x32xf32>
    %c0_3 = arith.constant 0 : index
    %c0_4 = arith.constant 0 : index
    %2 = vector.load %arg4[%c0_3, %c0_4] : memref<31x32xf32, #tpu.memory_space<vmem>>, vector<1x32xf32>
    %3 = vector.shape_cast %2 : vector<1x32xf32> to vector<32xf32>
    %c1 = arith.constant 1 : index
    %c0_5 = arith.constant 0 : index
    %4 = vector.load %arg4[%c1, %c0_5] : memref<31x32xf32, #tpu.memory_space<vmem>>, vector<1x32xf32>
    %5 = vector.shape_cast %4 : vector<1x32xf32> to vector<32xf32>
    %c2 = arith.constant 2 : index
    %c0_6 = arith.constant 0 : index
    %6 = vector.load %arg4[%c2, %c0_6] : memref<31x32xf32, #tpu.memory_space<vmem>>, vector<1x32xf32>
    %7 = vector.shape_cast %6 : vector<1x32xf32> to vector<32xf32>
    %cst = arith.constant dense<0.000000e+00> : vector<16x32xf32>
    %8 = tpu.matmul %0, %1, %cst {dimension_numbers = #tpu.dot_dimension_numbers<[1], [0], [0], [1], [0, 0, 1, 1], [], []>} : vector<16x10xf32>, vector<10x32xf32>, vector<16x32xf32> -> vector<16x32xf32>
    %9 = vector.shape_cast %3 : vector<32xf32> to vector<1x32xf32>
    %10 = vector.broadcast %9 : vector<1x32xf32> to vector<16x32xf32>
    %11 = arith.addf %8, %10 : vector<16x32xf32>
    %cst_7 = arith.constant dense<0.000000e+00> : vector<16xf32>
    %12 = vector.multi_reduction <add>, %11, %cst_7 [1] : vector<16x32xf32> to vector<16xf32>
    %13 = vector.shape_cast %12 : vector<16xf32> to vector<16x1xf32>
    %cst_8 = arith.constant 3.200000e+01 : f32
    %14 = vector.broadcast %cst_8 : f32 to vector<16x1xf32>
    %15 = arith.divf %13, %14 : vector<16x1xf32>
    %16 = arith.mulf %11, %11 : vector<16x32xf32>
    %cst_9 = arith.constant dense<0.000000e+00> : vector<16xf32>
    %17 = vector.multi_reduction <add>, %16, %cst_9 [1] : vector<16x32xf32> to vector<16xf32>
    %18 = vector.shape_cast %17 : vector<16xf32> to vector<16x1xf32>
    %cst_10 = arith.constant 3.200000e+01 : f32
    %19 = vector.broadcast %cst_10 : f32 to vector<16x1xf32>
    %20 = arith.divf %18, %19 : vector<16x1xf32>
    %21 = arith.mulf %15, %15 : vector<16x1xf32>
    %22 = arith.subf %20, %21 : vector<16x1xf32>
    %cst_11 = arith.constant 0.000000e+00 : f32
    %23 = vector.broadcast %cst_11 : f32 to vector<16x1xf32>
    %24 = arith.maximumf %22, %23 : vector<16x1xf32>
    %25 = vector.broadcast %15 : vector<16x1xf32> to vector<16x32xf32>
    %26 = arith.subf %11, %25 : vector<16x32xf32>
    %cst_12 = arith.constant 9.99999974E-6 : f32
    %27 = vector.broadcast %cst_12 : f32 to vector<16x1xf32>
    %28 = arith.addf %24, %27 : vector<16x1xf32>
    %29 = math.rsqrt %28 : vector<16x1xf32>
    %30 = vector.broadcast %29 : vector<16x1xf32> to vector<16x32xf32>
    %31 = arith.mulf %26, %30 : vector<16x32xf32>
    %32 = vector.shape_cast %5 : vector<32xf32> to vector<1x32xf32>
    %33 = vector.broadcast %32 : vector<1x32xf32> to vector<16x32xf32>
    %34 = arith.mulf %31, %33 : vector<16x32xf32>
    %35 = vector.shape_cast %7 : vector<32xf32> to vector<1x32xf32>
    %36 = vector.broadcast %35 : vector<1x32xf32> to vector<16x32xf32>
    %37 = arith.addf %34, %36 : vector<16x32xf32>
    %cst_13 = arith.constant 0.000000e+00 : f32
    %38 = vector.broadcast %cst_13 : f32 to vector<16x32xf32>
    %39 = arith.maximumf %37, %38 : vector<16x32xf32>
    %c0_14 = arith.constant 0 : index
    %c0_15 = arith.constant 0 : index
    %c0_16 = arith.constant 0 : index
    %40 = vector.load %arg3[%c0_14, %c0_15, %c0_16] : memref<10x32x32xf32, #tpu.memory_space<vmem>>, vector<1x32x32xf32>
    %41 = vector.shape_cast %40 : vector<1x32x32xf32> to vector<32x32xf32>
    %c3 = arith.constant 3 : index
    %c0_17 = arith.constant 0 : index
    %42 = vector.load %arg4[%c3, %c0_17] : memref<31x32xf32, #tpu.memory_space<vmem>>, vector<1x32xf32>
    %43 = vector.shape_cast %42 : vector<1x32xf32> to vector<32xf32>
    %c4 = arith.constant 4 : index
    %c0_18 = arith.constant 0 : index
    %44 = vector.load %arg4[%c4, %c0_18] : memref<31x32xf32, #tpu.memory_space<vmem>>, vector<1x32xf32>
    %45 = vector.shape_cast %44 : vector<1x32xf32> to vector<32xf32>
    %c5 = arith.constant 5 : index
    %c0_19 = arith.constant 0 : index
    %46 = vector.load %arg4[%c5, %c0_19] : memref<31x32xf32, #tpu.memory_space<vmem>>, vector<1x32xf32>
    %47 = vector.shape_cast %46 : vector<1x32xf32> to vector<32xf32>
    %cst_20 = arith.constant dense<0.000000e+00> : vector<16x32xf32>
    %48 = tpu.matmul %39, %41, %cst_20 {dimension_numbers = #tpu.dot_dimension_numbers<[1], [0], [0], [1], [0, 0, 1, 1], [], []>} : vector<16x32xf32>, vector<32x32xf32>, vector<16x32xf32> -> vector<16x32xf32>
    %49 = vector.shape_cast %43 : vector<32xf32> to vector<1x32xf32>
    %50 = vector.broadcast %49 : vector<1x32xf32> to vector<16x32xf32>
    %51 = arith.addf %48, %50 : vector<16x32xf32>
    %cst_21 = arith.constant dense<0.000000e+00> : vector<16xf32>
    %52 = vector.multi_reduction <add>, %51, %cst_21 [1] : vector<16x32xf32> to vector<16xf32>
    %53 = vector.shape_cast %52 : vector<16xf32> to vector<16x1xf32>
    %cst_22 = arith.constant 3.200000e+01 : f32
    %54 = vector.broadcast %cst_22 : f32 to vector<16x1xf32>
    %55 = arith.divf %53, %54 : vector<16x1xf32>
    %56 = arith.mulf %51, %51 : vector<16x32xf32>
    %cst_23 = arith.constant dense<0.000000e+00> : vector<16xf32>
    %57 = vector.multi_reduction <add>, %56, %cst_23 [1] : vector<16x32xf32> to vector<16xf32>
    %58 = vector.shape_cast %57 : vector<16xf32> to vector<16x1xf32>
    %cst_24 = arith.constant 3.200000e+01 : f32
    %59 = vector.broadcast %cst_24 : f32 to vector<16x1xf32>
    %60 = arith.divf %58, %59 : vector<16x1xf32>
    %61 = arith.mulf %55, %55 : vector<16x1xf32>
    %62 = arith.subf %60, %61 : vector<16x1xf32>
    %cst_25 = arith.constant 0.000000e+00 : f32
    %63 = vector.broadcast %cst_25 : f32 to vector<16x1xf32>
    %64 = arith.maximumf %62, %63 : vector<16x1xf32>
    %65 = vector.broadcast %55 : vector<16x1xf32> to vector<16x32xf32>
    %66 = arith.subf %51, %65 : vector<16x32xf32>
    %cst_26 = arith.constant 9.99999974E-6 : f32
    %67 = vector.broadcast %cst_26 : f32 to vector<16x1xf32>
    %68 = arith.addf %64, %67 : vector<16x1xf32>
    %69 = math.rsqrt %68 : vector<16x1xf32>
    %70 = vector.broadcast %69 : vector<16x1xf32> to vector<16x32xf32>
    %71 = arith.mulf %66, %70 : vector<16x32xf32>
    %72 = vector.shape_cast %45 : vector<32xf32> to vector<1x32xf32>
    %73 = vector.broadcast %72 : vector<1x32xf32> to vector<16x32xf32>
    %74 = arith.mulf %71, %73 : vector<16x32xf32>
    %75 = vector.shape_cast %47 : vector<32xf32> to vector<1x32xf32>
    %76 = vector.broadcast %75 : vector<1x32xf32> to vector<16x32xf32>
    %77 = arith.addf %74, %76 : vector<16x32xf32>
    %cst_27 = arith.constant 0.000000e+00 : f32
    %78 = vector.broadcast %cst_27 : f32 to vector<16x32xf32>
    %79 = arith.maximumf %77, %78 : vector<16x32xf32>
    %c1_28 = arith.constant 1 : index
    %c0_29 = arith.constant 0 : index
    %c0_30 = arith.constant 0 : index
    %80 = vector.load %arg3[%c1_28, %c0_29, %c0_30] : memref<10x32x32xf32, #tpu.memory_space<vmem>>, vector<1x32x32xf32>
    %81 = vector.shape_cast %80 : vector<1x32x32xf32> to vector<32x32xf32>
    %c6 = arith.constant 6 : index
    %c0_31 = arith.constant 0 : index
    %82 = vector.load %arg4[%c6, %c0_31] : memref<31x32xf32, #tpu.memory_space<vmem>>, vector<1x32xf32>
    %83 = vector.shape_cast %82 : vector<1x32xf32> to vector<32xf32>
    %c7 = arith.constant 7 : index
    %c0_32 = arith.constant 0 : index
    %84 = vector.load %arg4[%c7, %c0_32] : memref<31x32xf32, #tpu.memory_space<vmem>>, vector<1x32xf32>
    %85 = vector.shape_cast %84 : vector<1x32xf32> to vector<32xf32>
    %c8 = arith.constant 8 : index
    %c0_33 = arith.constant 0 : index
    %86 = vector.load %arg4[%c8, %c0_33] : memref<31x32xf32, #tpu.memory_space<vmem>>, vector<1x32xf32>
    %87 = vector.shape_cast %86 : vector<1x32xf32> to vector<32xf32>
    %cst_34 = arith.constant dense<0.000000e+00> : vector<16x32xf32>
    %88 = tpu.matmul %79, %81, %cst_34 {dimension_numbers = #tpu.dot_dimension_numbers<[1], [0], [0], [1], [0, 0, 1, 1], [], []>} : vector<16x32xf32>, vector<32x32xf32>, vector<16x32xf32> -> vector<16x32xf32>
    %89 = vector.shape_cast %83 : vector<32xf32> to vector<1x32xf32>
    %90 = vector.broadcast %89 : vector<1x32xf32> to vector<16x32xf32>
    %91 = arith.addf %88, %90 : vector<16x32xf32>
    %cst_35 = arith.constant dense<0.000000e+00> : vector<16xf32>
    %92 = vector.multi_reduction <add>, %91, %cst_35 [1] : vector<16x32xf32> to vector<16xf32>
    %93 = vector.shape_cast %92 : vector<16xf32> to vector<16x1xf32>
    %cst_36 = arith.constant 3.200000e+01 : f32
    %94 = vector.broadcast %cst_36 : f32 to vector<16x1xf32>
    %95 = arith.divf %93, %94 : vector<16x1xf32>
    %96 = arith.mulf %91, %91 : vector<16x32xf32>
    %cst_37 = arith.constant dense<0.000000e+00> : vector<16xf32>
    %97 = vector.multi_reduction <add>, %96, %cst_37 [1] : vector<16x32xf32> to vector<16xf32>
    %98 = vector.shape_cast %97 : vector<16xf32> to vector<16x1xf32>
    %cst_38 = arith.constant 3.200000e+01 : f32
    %99 = vector.broadcast %cst_38 : f32 to vector<16x1xf32>
    %100 = arith.divf %98, %99 : vector<16x1xf32>
    %101 = arith.mulf %95, %95 : vector<16x1xf32>
    %102 = arith.subf %100, %101 : vector<16x1xf32>
    %cst_39 = arith.constant 0.000000e+00 : f32
    %103 = vector.broadcast %cst_39 : f32 to vector<16x1xf32>
    %104 = arith.maximumf %102, %103 : vector<16x1xf32>
    %105 = vector.broadcast %95 : vector<16x1xf32> to vector<16x32xf32>
    %106 = arith.subf %91, %105 : vector<16x32xf32>
    %cst_40 = arith.constant 9.99999974E-6 : f32
    %107 = vector.broadcast %cst_40 : f32 to vector<16x1xf32>
    %108 = arith.addf %104, %107 : vector<16x1xf32>
    %109 = math.rsqrt %108 : vector<16x1xf32>
    %110 = vector.broadcast %109 : vector<16x1xf32> to vector<16x32xf32>
    %111 = arith.mulf %106, %110 : vector<16x32xf32>
    %112 = vector.shape_cast %85 : vector<32xf32> to vector<1x32xf32>
    %113 = vector.broadcast %112 : vector<1x32xf32> to vector<16x32xf32>
    %114 = arith.mulf %111, %113 : vector<16x32xf32>
    %115 = vector.shape_cast %87 : vector<32xf32> to vector<1x32xf32>
    %116 = vector.broadcast %115 : vector<1x32xf32> to vector<16x32xf32>
    %117 = arith.addf %114, %116 : vector<16x32xf32>
    %cst_41 = arith.constant 0.000000e+00 : f32
    %118 = vector.broadcast %cst_41 : f32 to vector<16x32xf32>
    %119 = arith.maximumf %117, %118 : vector<16x32xf32>
    %120 = vector.shape_cast %119 : vector<16x32xf32> to vector<2x8x32xf32>
    %cst_42 = arith.constant dense<0xFF800000> : vector<2x32xf32>
    %121 = vector.multi_reduction <maximumf>, %120, %cst_42 [1] : vector<2x8x32xf32> to vector<2x32xf32>
    %c3_43 = arith.constant 3 : index
    %c0_44 = arith.constant 0 : index
    %c0_45 = arith.constant 0 : index
    %122 = vector.load %arg3[%c3_43, %c0_44, %c0_45] : memref<10x32x32xf32, #tpu.memory_space<vmem>>, vector<1x32x32xf32>
    %123 = vector.shape_cast %122 : vector<1x32x32xf32> to vector<32x32xf32>
    %cst_46 = arith.constant dense<0.000000e+00> : vector<2x32xf32>
    %124 = tpu.matmul %121, %123, %cst_46 {dimension_numbers = #tpu.dot_dimension_numbers<[1], [0], [0], [1], [0, 0, 1, 1], [], []>} : vector<2x32xf32>, vector<32x32xf32>, vector<2x32xf32> -> vector<2x32xf32>
    %c2_47 = arith.constant 2 : index
    %c0_48 = arith.constant 0 : index
    %c0_49 = arith.constant 0 : index
    %125 = vector.load %arg3[%c2_47, %c0_48, %c0_49] : memref<10x32x32xf32, #tpu.memory_space<vmem>>, vector<1x32x32xf32>
    %126 = vector.shape_cast %125 : vector<1x32x32xf32> to vector<32x32xf32>
    %cst_50 = arith.constant dense<0.000000e+00> : vector<16x32xf32>
    %127 = tpu.matmul %119, %126, %cst_50 {dimension_numbers = #tpu.dot_dimension_numbers<[1], [0], [0], [1], [0, 0, 1, 1], [], []>} : vector<16x32xf32>, vector<32x32xf32>, vector<16x32xf32> -> vector<16x32xf32>
    %128 = vector.shape_cast %127 : vector<16x32xf32> to vector<2x8x32xf32>
    %129 = vector.shape_cast %124 : vector<2x32xf32> to vector<2x1x32xf32>
    %130 = vector.broadcast %129 : vector<2x1x32xf32> to vector<2x8x32xf32>
    %131 = arith.addf %128, %130 : vector<2x8x32xf32>
    %c9 = arith.constant 9 : index
    %c0_51 = arith.constant 0 : index
    %132 = vector.load %arg4[%c9, %c0_51] : memref<31x32xf32, #tpu.memory_space<vmem>>, vector<1x32xf32>
    %133 = vector.shape_cast %132 : vector<1x32xf32> to vector<32xf32>
    %134 = vector.shape_cast %133 : vector<32xf32> to vector<1x1x32xf32>
    %135 = vector.broadcast %134 : vector<1x1x32xf32> to vector<2x8x32xf32>
    %136 = arith.addf %131, %135 : vector<2x8x32xf32>
    %c10 = arith.constant 10 : index
    %c0_52 = arith.constant 0 : index
    %137 = vector.load %arg4[%c10, %c0_52] : memref<31x32xf32, #tpu.memory_space<vmem>>, vector<1x32xf32>
    %138 = vector.shape_cast %137 : vector<1x32xf32> to vector<32xf32>
    %c11 = arith.constant 11 : index
    %c0_53 = arith.constant 0 : index
    %139 = vector.load %arg4[%c11, %c0_53] : memref<31x32xf32, #tpu.memory_space<vmem>>, vector<1x32xf32>
    %140 = vector.shape_cast %139 : vector<1x32xf32> to vector<32xf32>
    %cst_54 = arith.constant dense<0.000000e+00> : vector<2x8xf32>
    %141 = vector.multi_reduction <add>, %136, %cst_54 [2] : vector<2x8x32xf32> to vector<2x8xf32>
    %142 = vector.shape_cast %141 : vector<2x8xf32> to vector<2x8x1xf32>
    %cst_55 = arith.constant 3.200000e+01 : f32
    %143 = vector.broadcast %cst_55 : f32 to vector<2x8x1xf32>
    %144 = arith.divf %142, %143 : vector<2x8x1xf32>
    %145 = arith.mulf %136, %136 : vector<2x8x32xf32>
    %cst_56 = arith.constant dense<0.000000e+00> : vector<2x8xf32>
    %146 = vector.multi_reduction <add>, %145, %cst_56 [2] : vector<2x8x32xf32> to vector<2x8xf32>
    %147 = vector.shape_cast %146 : vector<2x8xf32> to vector<2x8x1xf32>
    %cst_57 = arith.constant 3.200000e+01 : f32
    %148 = vector.broadcast %cst_57 : f32 to vector<2x8x1xf32>
    %149 = arith.divf %147, %148 : vector<2x8x1xf32>
    %150 = arith.mulf %144, %144 : vector<2x8x1xf32>
    %151 = arith.subf %149, %150 : vector<2x8x1xf32>
    %cst_58 = arith.constant 0.000000e+00 : f32
    %152 = vector.broadcast %cst_58 : f32 to vector<2x8x1xf32>
    %153 = arith.maximumf %151, %152 : vector<2x8x1xf32>
    %154 = vector.broadcast %144 : vector<2x8x1xf32> to vector<2x8x32xf32>
    %155 = arith.subf %136, %154 : vector<2x8x32xf32>
    %cst_59 = arith.constant 9.99999974E-6 : f32
    %156 = vector.broadcast %cst_59 : f32 to vector<2x8x1xf32>
    %157 = arith.addf %153, %156 : vector<2x8x1xf32>
    %158 = math.rsqrt %157 : vector<2x8x1xf32>
    %159 = vector.broadcast %158 : vector<2x8x1xf32> to vector<2x8x32xf32>
    %160 = arith.mulf %155, %159 : vector<2x8x32xf32>
    %161 = vector.shape_cast %138 : vector<32xf32> to vector<1x1x32xf32>
    %162 = vector.broadcast %161 : vector<1x1x32xf32> to vector<2x8x32xf32>
    %163 = arith.mulf %160, %162 : vector<2x8x32xf32>
    %164 = vector.shape_cast %140 : vector<32xf32> to vector<1x1x32xf32>
    %165 = vector.broadcast %164 : vector<1x1x32xf32> to vector<2x8x32xf32>
    %166 = arith.addf %163, %165 : vector<2x8x32xf32>
    %cst_60 = arith.constant 0.000000e+00 : f32
    %167 = vector.broadcast %cst_60 : f32 to vector<2x8x32xf32>
    %168 = arith.maximumf %166, %167 : vector<2x8x32xf32>
    %169 = vector.shape_cast %168 : vector<2x8x32xf32> to vector<16x32xf32>
    %c4_61 = arith.constant 4 : index
    %c0_62 = arith.constant 0 : index
    %c0_63 = arith.constant 0 : index
    %170 = vector.load %arg3[%c4_61, %c0_62, %c0_63] : memref<10x32x32xf32, #tpu.memory_space<vmem>>, vector<1x32x32xf32>
    %171 = vector.shape_cast %170 : vector<1x32x32xf32> to vector<32x32xf32>
    %c12 = arith.constant 12 : index
    %c0_64 = arith.constant 0 : index
    %172 = vector.load %arg4[%c12, %c0_64] : memref<31x32xf32, #tpu.memory_space<vmem>>, vector<1x32xf32>
    %173 = vector.shape_cast %172 : vector<1x32xf32> to vector<32xf32>
    %c13 = arith.constant 13 : index
    %c0_65 = arith.constant 0 : index
    %174 = vector.load %arg4[%c13, %c0_65] : memref<31x32xf32, #tpu.memory_space<vmem>>, vector<1x32xf32>
    %175 = vector.shape_cast %174 : vector<1x32xf32> to vector<32xf32>
    %c14 = arith.constant 14 : index
    %c0_66 = arith.constant 0 : index
    %176 = vector.load %arg4[%c14, %c0_66] : memref<31x32xf32, #tpu.memory_space<vmem>>, vector<1x32xf32>
    %177 = vector.shape_cast %176 : vector<1x32xf32> to vector<32xf32>
    %cst_67 = arith.constant dense<0.000000e+00> : vector<16x32xf32>
    %178 = tpu.matmul %169, %171, %cst_67 {dimension_numbers = #tpu.dot_dimension_numbers<[1], [0], [0], [1], [0, 0, 1, 1], [], []>} : vector<16x32xf32>, vector<32x32xf32>, vector<16x32xf32> -> vector<16x32xf32>
    %179 = vector.shape_cast %173 : vector<32xf32> to vector<1x32xf32>
    %180 = vector.broadcast %179 : vector<1x32xf32> to vector<16x32xf32>
    %181 = arith.addf %178, %180 : vector<16x32xf32>
    %cst_68 = arith.constant dense<0.000000e+00> : vector<16xf32>
    %182 = vector.multi_reduction <add>, %181, %cst_68 [1] : vector<16x32xf32> to vector<16xf32>
    %183 = vector.shape_cast %182 : vector<16xf32> to vector<16x1xf32>
    %cst_69 = arith.constant 3.200000e+01 : f32
    %184 = vector.broadcast %cst_69 : f32 to vector<16x1xf32>
    %185 = arith.divf %183, %184 : vector<16x1xf32>
    %186 = arith.mulf %181, %181 : vector<16x32xf32>
    %cst_70 = arith.constant dense<0.000000e+00> : vector<16xf32>
    %187 = vector.multi_reduction <add>, %186, %cst_70 [1] : vector<16x32xf32> to vector<16xf32>
    %188 = vector.shape_cast %187 : vector<16xf32> to vector<16x1xf32>
    %cst_71 = arith.constant 3.200000e+01 : f32
    %189 = vector.broadcast %cst_71 : f32 to vector<16x1xf32>
    %190 = arith.divf %188, %189 : vector<16x1xf32>
    %191 = arith.mulf %185, %185 : vector<16x1xf32>
    %192 = arith.subf %190, %191 : vector<16x1xf32>
    %cst_72 = arith.constant 0.000000e+00 : f32
    %193 = vector.broadcast %cst_72 : f32 to vector<16x1xf32>
    %194 = arith.maximumf %192, %193 : vector<16x1xf32>
    %195 = vector.broadcast %185 : vector<16x1xf32> to vector<16x32xf32>
    %196 = arith.subf %181, %195 : vector<16x32xf32>
    %cst_73 = arith.constant 9.99999974E-6 : f32
    %197 = vector.broadcast %cst_73 : f32 to vector<16x1xf32>
    %198 = arith.addf %194, %197 : vector<16x1xf32>
    %199 = math.rsqrt %198 : vector<16x1xf32>
    %200 = vector.broadcast %199 : vector<16x1xf32> to vector<16x32xf32>
    %201 = arith.mulf %196, %200 : vector<16x32xf32>
    %202 = vector.shape_cast %175 : vector<32xf32> to vector<1x32xf32>
    %203 = vector.broadcast %202 : vector<1x32xf32> to vector<16x32xf32>
    %204 = arith.mulf %201, %203 : vector<16x32xf32>
    %205 = vector.shape_cast %177 : vector<32xf32> to vector<1x32xf32>
    %206 = vector.broadcast %205 : vector<1x32xf32> to vector<16x32xf32>
    %207 = arith.addf %204, %206 : vector<16x32xf32>
    %cst_74 = arith.constant 0.000000e+00 : f32
    %208 = vector.broadcast %cst_74 : f32 to vector<16x32xf32>
    %209 = arith.maximumf %207, %208 : vector<16x32xf32>
    %210 = arith.addf %39, %209 : vector<16x32xf32>
    %c15 = arith.constant 15 : index
    %c0_75 = arith.constant 0 : index
    %211 = vector.load %arg4[%c15, %c0_75] : memref<31x32xf32, #tpu.memory_space<vmem>>, vector<1x32xf32>
    %212 = vector.shape_cast %211 : vector<1x32xf32> to vector<32xf32>
    %c16 = arith.constant 16 : index
    %c0_76 = arith.constant 0 : index
    %213 = vector.load %arg4[%c16, %c0_76] : memref<31x32xf32, #tpu.memory_space<vmem>>, vector<1x32xf32>
    %214 = vector.shape_cast %213 : vector<1x32xf32> to vector<32xf32>
    %cst_77 = arith.constant dense<0.000000e+00> : vector<16xf32>
    %215 = vector.multi_reduction <add>, %210, %cst_77 [1] : vector<16x32xf32> to vector<16xf32>
    %216 = vector.shape_cast %215 : vector<16xf32> to vector<16x1xf32>
    %cst_78 = arith.constant 3.200000e+01 : f32
    %217 = vector.broadcast %cst_78 : f32 to vector<16x1xf32>
    %218 = arith.divf %216, %217 : vector<16x1xf32>
    %219 = arith.mulf %210, %210 : vector<16x32xf32>
    %cst_79 = arith.constant dense<0.000000e+00> : vector<16xf32>
    %220 = vector.multi_reduction <add>, %219, %cst_79 [1] : vector<16x32xf32> to vector<16xf32>
    %221 = vector.shape_cast %220 : vector<16xf32> to vector<16x1xf32>
    %cst_80 = arith.constant 3.200000e+01 : f32
    %222 = vector.broadcast %cst_80 : f32 to vector<16x1xf32>
    %223 = arith.divf %221, %222 : vector<16x1xf32>
    %224 = arith.mulf %218, %218 : vector<16x1xf32>
    %225 = arith.subf %223, %224 : vector<16x1xf32>
    %cst_81 = arith.constant 0.000000e+00 : f32
    %226 = vector.broadcast %cst_81 : f32 to vector<16x1xf32>
    %227 = arith.maximumf %225, %226 : vector<16x1xf32>
    %228 = vector.broadcast %218 : vector<16x1xf32> to vector<16x32xf32>
    %229 = arith.subf %210, %228 : vector<16x32xf32>
    %cst_82 = arith.constant 9.99999974E-6 : f32
    %230 = vector.broadcast %cst_82 : f32 to vector<16x1xf32>
    %231 = arith.addf %227, %230 : vector<16x1xf32>
    %232 = math.rsqrt %231 : vector<16x1xf32>
    %233 = vector.broadcast %232 : vector<16x1xf32> to vector<16x32xf32>
    %234 = arith.mulf %229, %233 : vector<16x32xf32>
    %235 = vector.shape_cast %212 : vector<32xf32> to vector<1x32xf32>
    %236 = vector.broadcast %235 : vector<1x32xf32> to vector<16x32xf32>
    %237 = arith.mulf %234, %236 : vector<16x32xf32>
    %238 = vector.shape_cast %214 : vector<32xf32> to vector<1x32xf32>
    %239 = vector.broadcast %238 : vector<1x32xf32> to vector<16x32xf32>
    %240 = arith.addf %237, %239 : vector<16x32xf32>
    %c5_83 = arith.constant 5 : index
    %c0_84 = arith.constant 0 : index
    %c0_85 = arith.constant 0 : index
    %241 = vector.load %arg3[%c5_83, %c0_84, %c0_85] : memref<10x32x32xf32, #tpu.memory_space<vmem>>, vector<1x32x32xf32>
    %242 = vector.shape_cast %241 : vector<1x32x32xf32> to vector<32x32xf32>
    %c17 = arith.constant 17 : index
    %c0_86 = arith.constant 0 : index
    %243 = vector.load %arg4[%c17, %c0_86] : memref<31x32xf32, #tpu.memory_space<vmem>>, vector<1x32xf32>
    %244 = vector.shape_cast %243 : vector<1x32xf32> to vector<32xf32>
    %c18 = arith.constant 18 : index
    %c0_87 = arith.constant 0 : index
    %245 = vector.load %arg4[%c18, %c0_87] : memref<31x32xf32, #tpu.memory_space<vmem>>, vector<1x32xf32>
    %246 = vector.shape_cast %245 : vector<1x32xf32> to vector<32xf32>
    %c19 = arith.constant 19 : index
    %c0_88 = arith.constant 0 : index
    %247 = vector.load %arg4[%c19, %c0_88] : memref<31x32xf32, #tpu.memory_space<vmem>>, vector<1x32xf32>
    %248 = vector.shape_cast %247 : vector<1x32xf32> to vector<32xf32>
    %cst_89 = arith.constant dense<0.000000e+00> : vector<16x32xf32>
    %249 = tpu.matmul %240, %242, %cst_89 {dimension_numbers = #tpu.dot_dimension_numbers<[1], [0], [0], [1], [0, 0, 1, 1], [], []>} : vector<16x32xf32>, vector<32x32xf32>, vector<16x32xf32> -> vector<16x32xf32>
    %250 = vector.shape_cast %244 : vector<32xf32> to vector<1x32xf32>
    %251 = vector.broadcast %250 : vector<1x32xf32> to vector<16x32xf32>
    %252 = arith.addf %249, %251 : vector<16x32xf32>
    %cst_90 = arith.constant dense<0.000000e+00> : vector<16xf32>
    %253 = vector.multi_reduction <add>, %252, %cst_90 [1] : vector<16x32xf32> to vector<16xf32>
    %254 = vector.shape_cast %253 : vector<16xf32> to vector<16x1xf32>
    %cst_91 = arith.constant 3.200000e+01 : f32
    %255 = vector.broadcast %cst_91 : f32 to vector<16x1xf32>
    %256 = arith.divf %254, %255 : vector<16x1xf32>
    %257 = arith.mulf %252, %252 : vector<16x32xf32>
    %cst_92 = arith.constant dense<0.000000e+00> : vector<16xf32>
    %258 = vector.multi_reduction <add>, %257, %cst_92 [1] : vector<16x32xf32> to vector<16xf32>
    %259 = vector.shape_cast %258 : vector<16xf32> to vector<16x1xf32>
    %cst_93 = arith.constant 3.200000e+01 : f32
    %260 = vector.broadcast %cst_93 : f32 to vector<16x1xf32>
    %261 = arith.divf %259, %260 : vector<16x1xf32>
    %262 = arith.mulf %256, %256 : vector<16x1xf32>
    %263 = arith.subf %261, %262 : vector<16x1xf32>
    %cst_94 = arith.constant 0.000000e+00 : f32
    %264 = vector.broadcast %cst_94 : f32 to vector<16x1xf32>
    %265 = arith.maximumf %263, %264 : vector<16x1xf32>
    %266 = vector.broadcast %256 : vector<16x1xf32> to vector<16x32xf32>
    %267 = arith.subf %252, %266 : vector<16x32xf32>
    %cst_95 = arith.constant 9.99999974E-6 : f32
    %268 = vector.broadcast %cst_95 : f32 to vector<16x1xf32>
    %269 = arith.addf %265, %268 : vector<16x1xf32>
    %270 = math.rsqrt %269 : vector<16x1xf32>
    %271 = vector.broadcast %270 : vector<16x1xf32> to vector<16x32xf32>
    %272 = arith.mulf %267, %271 : vector<16x32xf32>
    %273 = vector.shape_cast %246 : vector<32xf32> to vector<1x32xf32>
    %274 = vector.broadcast %273 : vector<1x32xf32> to vector<16x32xf32>
    %275 = arith.mulf %272, %274 : vector<16x32xf32>
    %276 = vector.shape_cast %248 : vector<32xf32> to vector<1x32xf32>
    %277 = vector.broadcast %276 : vector<1x32xf32> to vector<16x32xf32>
    %278 = arith.addf %275, %277 : vector<16x32xf32>
    %cst_96 = arith.constant 0.000000e+00 : f32
    %279 = vector.broadcast %cst_96 : f32 to vector<16x32xf32>
    %280 = arith.maximumf %278, %279 : vector<16x32xf32>
    %c6_97 = arith.constant 6 : index
    %c0_98 = arith.constant 0 : index
    %c0_99 = arith.constant 0 : index
    %281 = vector.load %arg3[%c6_97, %c0_98, %c0_99] : memref<10x32x32xf32, #tpu.memory_space<vmem>>, vector<1x32x32xf32>
    %282 = vector.shape_cast %281 : vector<1x32x32xf32> to vector<32x32xf32>
    %c20 = arith.constant 20 : index
    %c0_100 = arith.constant 0 : index
    %283 = vector.load %arg4[%c20, %c0_100] : memref<31x32xf32, #tpu.memory_space<vmem>>, vector<1x32xf32>
    %284 = vector.shape_cast %283 : vector<1x32xf32> to vector<32xf32>
    %c21 = arith.constant 21 : index
    %c0_101 = arith.constant 0 : index
    %285 = vector.load %arg4[%c21, %c0_101] : memref<31x32xf32, #tpu.memory_space<vmem>>, vector<1x32xf32>
    %286 = vector.shape_cast %285 : vector<1x32xf32> to vector<32xf32>
    %c22 = arith.constant 22 : index
    %c0_102 = arith.constant 0 : index
    %287 = vector.load %arg4[%c22, %c0_102] : memref<31x32xf32, #tpu.memory_space<vmem>>, vector<1x32xf32>
    %288 = vector.shape_cast %287 : vector<1x32xf32> to vector<32xf32>
    %cst_103 = arith.constant dense<0.000000e+00> : vector<16x32xf32>
    %289 = tpu.matmul %280, %282, %cst_103 {dimension_numbers = #tpu.dot_dimension_numbers<[1], [0], [0], [1], [0, 0, 1, 1], [], []>} : vector<16x32xf32>, vector<32x32xf32>, vector<16x32xf32> -> vector<16x32xf32>
    %290 = vector.shape_cast %284 : vector<32xf32> to vector<1x32xf32>
    %291 = vector.broadcast %290 : vector<1x32xf32> to vector<16x32xf32>
    %292 = arith.addf %289, %291 : vector<16x32xf32>
    %cst_104 = arith.constant dense<0.000000e+00> : vector<16xf32>
    %293 = vector.multi_reduction <add>, %292, %cst_104 [1] : vector<16x32xf32> to vector<16xf32>
    %294 = vector.shape_cast %293 : vector<16xf32> to vector<16x1xf32>
    %cst_105 = arith.constant 3.200000e+01 : f32
    %295 = vector.broadcast %cst_105 : f32 to vector<16x1xf32>
    %296 = arith.divf %294, %295 : vector<16x1xf32>
    %297 = arith.mulf %292, %292 : vector<16x32xf32>
    %cst_106 = arith.constant dense<0.000000e+00> : vector<16xf32>
    %298 = vector.multi_reduction <add>, %297, %cst_106 [1] : vector<16x32xf32> to vector<16xf32>
    %299 = vector.shape_cast %298 : vector<16xf32> to vector<16x1xf32>
    %cst_107 = arith.constant 3.200000e+01 : f32
    %300 = vector.broadcast %cst_107 : f32 to vector<16x1xf32>
    %301 = arith.divf %299, %300 : vector<16x1xf32>
    %302 = arith.mulf %296, %296 : vector<16x1xf32>
    %303 = arith.subf %301, %302 : vector<16x1xf32>
    %cst_108 = arith.constant 0.000000e+00 : f32
    %304 = vector.broadcast %cst_108 : f32 to vector<16x1xf32>
    %305 = arith.maximumf %303, %304 : vector<16x1xf32>
    %306 = vector.broadcast %296 : vector<16x1xf32> to vector<16x32xf32>
    %307 = arith.subf %292, %306 : vector<16x32xf32>
    %cst_109 = arith.constant 9.99999974E-6 : f32
    %308 = vector.broadcast %cst_109 : f32 to vector<16x1xf32>
    %309 = arith.addf %305, %308 : vector<16x1xf32>
    %310 = math.rsqrt %309 : vector<16x1xf32>
    %311 = vector.broadcast %310 : vector<16x1xf32> to vector<16x32xf32>
    %312 = arith.mulf %307, %311 : vector<16x32xf32>
    %313 = vector.shape_cast %286 : vector<32xf32> to vector<1x32xf32>
    %314 = vector.broadcast %313 : vector<1x32xf32> to vector<16x32xf32>
    %315 = arith.mulf %312, %314 : vector<16x32xf32>
    %316 = vector.shape_cast %288 : vector<32xf32> to vector<1x32xf32>
    %317 = vector.broadcast %316 : vector<1x32xf32> to vector<16x32xf32>
    %318 = arith.addf %315, %317 : vector<16x32xf32>
    %cst_110 = arith.constant 0.000000e+00 : f32
    %319 = vector.broadcast %cst_110 : f32 to vector<16x32xf32>
    %320 = arith.maximumf %318, %319 : vector<16x32xf32>
    %321 = vector.shape_cast %320 : vector<16x32xf32> to vector<2x8x32xf32>
    %cst_111 = arith.constant dense<0xFF800000> : vector<2x32xf32>
    %322 = vector.multi_reduction <maximumf>, %321, %cst_111 [1] : vector<2x8x32xf32> to vector<2x32xf32>
    %c8_112 = arith.constant 8 : index
    %c0_113 = arith.constant 0 : index
    %c0_114 = arith.constant 0 : index
    %323 = vector.load %arg3[%c8_112, %c0_113, %c0_114] : memref<10x32x32xf32, #tpu.memory_space<vmem>>, vector<1x32x32xf32>
    %324 = vector.shape_cast %323 : vector<1x32x32xf32> to vector<32x32xf32>
    %cst_115 = arith.constant dense<0.000000e+00> : vector<2x32xf32>
    %325 = tpu.matmul %322, %324, %cst_115 {dimension_numbers = #tpu.dot_dimension_numbers<[1], [0], [0], [1], [0, 0, 1, 1], [], []>} : vector<2x32xf32>, vector<32x32xf32>, vector<2x32xf32> -> vector<2x32xf32>
    %c7_116 = arith.constant 7 : index
    %c0_117 = arith.constant 0 : index
    %c0_118 = arith.constant 0 : index
    %326 = vector.load %arg3[%c7_116, %c0_117, %c0_118] : memref<10x32x32xf32, #tpu.memory_space<vmem>>, vector<1x32x32xf32>
    %327 = vector.shape_cast %326 : vector<1x32x32xf32> to vector<32x32xf32>
    %cst_119 = arith.constant dense<0.000000e+00> : vector<16x32xf32>
    %328 = tpu.matmul %320, %327, %cst_119 {dimension_numbers = #tpu.dot_dimension_numbers<[1], [0], [0], [1], [0, 0, 1, 1], [], []>} : vector<16x32xf32>, vector<32x32xf32>, vector<16x32xf32> -> vector<16x32xf32>
    %329 = vector.shape_cast %328 : vector<16x32xf32> to vector<2x8x32xf32>
    %330 = vector.shape_cast %325 : vector<2x32xf32> to vector<2x1x32xf32>
    %331 = vector.broadcast %330 : vector<2x1x32xf32> to vector<2x8x32xf32>
    %332 = arith.addf %329, %331 : vector<2x8x32xf32>
    %c23 = arith.constant 23 : index
    %c0_120 = arith.constant 0 : index
    %333 = vector.load %arg4[%c23, %c0_120] : memref<31x32xf32, #tpu.memory_space<vmem>>, vector<1x32xf32>
    %334 = vector.shape_cast %333 : vector<1x32xf32> to vector<32xf32>
    %335 = vector.shape_cast %334 : vector<32xf32> to vector<1x1x32xf32>
    %336 = vector.broadcast %335 : vector<1x1x32xf32> to vector<2x8x32xf32>
    %337 = arith.addf %332, %336 : vector<2x8x32xf32>
    %c24 = arith.constant 24 : index
    %c0_121 = arith.constant 0 : index
    %338 = vector.load %arg4[%c24, %c0_121] : memref<31x32xf32, #tpu.memory_space<vmem>>, vector<1x32xf32>
    %339 = vector.shape_cast %338 : vector<1x32xf32> to vector<32xf32>
    %c25 = arith.constant 25 : index
    %c0_122 = arith.constant 0 : index
    %340 = vector.load %arg4[%c25, %c0_122] : memref<31x32xf32, #tpu.memory_space<vmem>>, vector<1x32xf32>
    %341 = vector.shape_cast %340 : vector<1x32xf32> to vector<32xf32>
    %cst_123 = arith.constant dense<0.000000e+00> : vector<2x8xf32>
    %342 = vector.multi_reduction <add>, %337, %cst_123 [2] : vector<2x8x32xf32> to vector<2x8xf32>
    %343 = vector.shape_cast %342 : vector<2x8xf32> to vector<2x8x1xf32>
    %cst_124 = arith.constant 3.200000e+01 : f32
    %344 = vector.broadcast %cst_124 : f32 to vector<2x8x1xf32>
    %345 = arith.divf %343, %344 : vector<2x8x1xf32>
    %346 = arith.mulf %337, %337 : vector<2x8x32xf32>
    %cst_125 = arith.constant dense<0.000000e+00> : vector<2x8xf32>
    %347 = vector.multi_reduction <add>, %346, %cst_125 [2] : vector<2x8x32xf32> to vector<2x8xf32>
    %348 = vector.shape_cast %347 : vector<2x8xf32> to vector<2x8x1xf32>
    %cst_126 = arith.constant 3.200000e+01 : f32
    %349 = vector.broadcast %cst_126 : f32 to vector<2x8x1xf32>
    %350 = arith.divf %348, %349 : vector<2x8x1xf32>
    %351 = arith.mulf %345, %345 : vector<2x8x1xf32>
    %352 = arith.subf %350, %351 : vector<2x8x1xf32>
    %cst_127 = arith.constant 0.000000e+00 : f32
    %353 = vector.broadcast %cst_127 : f32 to vector<2x8x1xf32>
    %354 = arith.maximumf %352, %353 : vector<2x8x1xf32>
    %355 = vector.broadcast %345 : vector<2x8x1xf32> to vector<2x8x32xf32>
    %356 = arith.subf %337, %355 : vector<2x8x32xf32>
    %cst_128 = arith.constant 9.99999974E-6 : f32
    %357 = vector.broadcast %cst_128 : f32 to vector<2x8x1xf32>
    %358 = arith.addf %354, %357 : vector<2x8x1xf32>
    %359 = math.rsqrt %358 : vector<2x8x1xf32>
    %360 = vector.broadcast %359 : vector<2x8x1xf32> to vector<2x8x32xf32>
    %361 = arith.mulf %356, %360 : vector<2x8x32xf32>
    %362 = vector.shape_cast %339 : vector<32xf32> to vector<1x1x32xf32>
    %363 = vector.broadcast %362 : vector<1x1x32xf32> to vector<2x8x32xf32>
    %364 = arith.mulf %361, %363 : vector<2x8x32xf32>
    %365 = vector.shape_cast %341 : vector<32xf32> to vector<1x1x32xf32>
    %366 = vector.broadcast %365 : vector<1x1x32xf32> to vector<2x8x32xf32>
    %367 = arith.addf %364, %366 : vector<2x8x32xf32>
    %cst_129 = arith.constant 0.000000e+00 : f32
    %368 = vector.broadcast %cst_129 : f32 to vector<2x8x32xf32>
    %369 = arith.maximumf %367, %368 : vector<2x8x32xf32>
    %370 = vector.shape_cast %369 : vector<2x8x32xf32> to vector<16x32xf32>
    %c9_130 = arith.constant 9 : index
    %c0_131 = arith.constant 0 : index
    %c0_132 = arith.constant 0 : index
    %371 = vector.load %arg3[%c9_130, %c0_131, %c0_132] : memref<10x32x32xf32, #tpu.memory_space<vmem>>, vector<1x32x32xf32>
    %372 = vector.shape_cast %371 : vector<1x32x32xf32> to vector<32x32xf32>
    %c26 = arith.constant 26 : index
    %c0_133 = arith.constant 0 : index
    %373 = vector.load %arg4[%c26, %c0_133] : memref<31x32xf32, #tpu.memory_space<vmem>>, vector<1x32xf32>
    %374 = vector.shape_cast %373 : vector<1x32xf32> to vector<32xf32>
    %c27 = arith.constant 27 : index
    %c0_134 = arith.constant 0 : index
    %375 = vector.load %arg4[%c27, %c0_134] : memref<31x32xf32, #tpu.memory_space<vmem>>, vector<1x32xf32>
    %376 = vector.shape_cast %375 : vector<1x32xf32> to vector<32xf32>
    %c28 = arith.constant 28 : index
    %c0_135 = arith.constant 0 : index
    %377 = vector.load %arg4[%c28, %c0_135] : memref<31x32xf32, #tpu.memory_space<vmem>>, vector<1x32xf32>
    %378 = vector.shape_cast %377 : vector<1x32xf32> to vector<32xf32>
    %cst_136 = arith.constant dense<0.000000e+00> : vector<16x32xf32>
    %379 = tpu.matmul %370, %372, %cst_136 {dimension_numbers = #tpu.dot_dimension_numbers<[1], [0], [0], [1], [0, 0, 1, 1], [], []>} : vector<16x32xf32>, vector<32x32xf32>, vector<16x32xf32> -> vector<16x32xf32>
    %380 = vector.shape_cast %374 : vector<32xf32> to vector<1x32xf32>
    %381 = vector.broadcast %380 : vector<1x32xf32> to vector<16x32xf32>
    %382 = arith.addf %379, %381 : vector<16x32xf32>
    %cst_137 = arith.constant dense<0.000000e+00> : vector<16xf32>
    %383 = vector.multi_reduction <add>, %382, %cst_137 [1] : vector<16x32xf32> to vector<16xf32>
    %384 = vector.shape_cast %383 : vector<16xf32> to vector<16x1xf32>
    %cst_138 = arith.constant 3.200000e+01 : f32
    %385 = vector.broadcast %cst_138 : f32 to vector<16x1xf32>
    %386 = arith.divf %384, %385 : vector<16x1xf32>
    %387 = arith.mulf %382, %382 : vector<16x32xf32>
    %cst_139 = arith.constant dense<0.000000e+00> : vector<16xf32>
    %388 = vector.multi_reduction <add>, %387, %cst_139 [1] : vector<16x32xf32> to vector<16xf32>
    %389 = vector.shape_cast %388 : vector<16xf32> to vector<16x1xf32>
    %cst_140 = arith.constant 3.200000e+01 : f32
    %390 = vector.broadcast %cst_140 : f32 to vector<16x1xf32>
    %391 = arith.divf %389, %390 : vector<16x1xf32>
    %392 = arith.mulf %386, %386 : vector<16x1xf32>
    %393 = arith.subf %391, %392 : vector<16x1xf32>
    %cst_141 = arith.constant 0.000000e+00 : f32
    %394 = vector.broadcast %cst_141 : f32 to vector<16x1xf32>
    %395 = arith.maximumf %393, %394 : vector<16x1xf32>
    %396 = vector.broadcast %386 : vector<16x1xf32> to vector<16x32xf32>
    %397 = arith.subf %382, %396 : vector<16x32xf32>
    %cst_142 = arith.constant 9.99999974E-6 : f32
    %398 = vector.broadcast %cst_142 : f32 to vector<16x1xf32>
    %399 = arith.addf %395, %398 : vector<16x1xf32>
    %400 = math.rsqrt %399 : vector<16x1xf32>
    %401 = vector.broadcast %400 : vector<16x1xf32> to vector<16x32xf32>
    %402 = arith.mulf %397, %401 : vector<16x32xf32>
    %403 = vector.shape_cast %376 : vector<32xf32> to vector<1x32xf32>
    %404 = vector.broadcast %403 : vector<1x32xf32> to vector<16x32xf32>
    %405 = arith.mulf %402, %404 : vector<16x32xf32>
    %406 = vector.shape_cast %378 : vector<32xf32> to vector<1x32xf32>
    %407 = vector.broadcast %406 : vector<1x32xf32> to vector<16x32xf32>
    %408 = arith.addf %405, %407 : vector<16x32xf32>
    %cst_143 = arith.constant 0.000000e+00 : f32
    %409 = vector.broadcast %cst_143 : f32 to vector<16x32xf32>
    %410 = arith.maximumf %408, %409 : vector<16x32xf32>
    %411 = arith.addf %240, %410 : vector<16x32xf32>
    %c29 = arith.constant 29 : index
    %c0_144 = arith.constant 0 : index
    %412 = vector.load %arg4[%c29, %c0_144] : memref<31x32xf32, #tpu.memory_space<vmem>>, vector<1x32xf32>
    %413 = vector.shape_cast %412 : vector<1x32xf32> to vector<32xf32>
    %c30 = arith.constant 30 : index
    %c0_145 = arith.constant 0 : index
    %414 = vector.load %arg4[%c30, %c0_145] : memref<31x32xf32, #tpu.memory_space<vmem>>, vector<1x32xf32>
    %415 = vector.shape_cast %414 : vector<1x32xf32> to vector<32xf32>
    %cst_146 = arith.constant dense<0.000000e+00> : vector<16xf32>
    %416 = vector.multi_reduction <add>, %411, %cst_146 [1] : vector<16x32xf32> to vector<16xf32>
    %417 = vector.shape_cast %416 : vector<16xf32> to vector<16x1xf32>
    %cst_147 = arith.constant 3.200000e+01 : f32
    %418 = vector.broadcast %cst_147 : f32 to vector<16x1xf32>
    %419 = arith.divf %417, %418 : vector<16x1xf32>
    %420 = arith.mulf %411, %411 : vector<16x32xf32>
    %cst_148 = arith.constant dense<0.000000e+00> : vector<16xf32>
    %421 = vector.multi_reduction <add>, %420, %cst_148 [1] : vector<16x32xf32> to vector<16xf32>
    %422 = vector.shape_cast %421 : vector<16xf32> to vector<16x1xf32>
    %cst_149 = arith.constant 3.200000e+01 : f32
    %423 = vector.broadcast %cst_149 : f32 to vector<16x1xf32>
    %424 = arith.divf %422, %423 : vector<16x1xf32>
    %425 = arith.mulf %419, %419 : vector<16x1xf32>
    %426 = arith.subf %424, %425 : vector<16x1xf32>
    %cst_150 = arith.constant 0.000000e+00 : f32
    %427 = vector.broadcast %cst_150 : f32 to vector<16x1xf32>
    %428 = arith.maximumf %426, %427 : vector<16x1xf32>
    %429 = vector.broadcast %419 : vector<16x1xf32> to vector<16x32xf32>
    %430 = arith.subf %411, %429 : vector<16x32xf32>
    %cst_151 = arith.constant 9.99999974E-6 : f32
    %431 = vector.broadcast %cst_151 : f32 to vector<16x1xf32>
    %432 = arith.addf %428, %431 : vector<16x1xf32>
    %433 = math.rsqrt %432 : vector<16x1xf32>
    %434 = vector.broadcast %433 : vector<16x1xf32> to vector<16x32xf32>
    %435 = arith.mulf %430, %434 : vector<16x32xf32>
    %436 = vector.shape_cast %413 : vector<32xf32> to vector<1x32xf32>
    %437 = vector.broadcast %436 : vector<1x32xf32> to vector<16x32xf32>
    %438 = arith.mulf %435, %437 : vector<16x32xf32>
    %439 = vector.shape_cast %415 : vector<32xf32> to vector<1x32xf32>
    %440 = vector.broadcast %439 : vector<1x32xf32> to vector<16x32xf32>
    %441 = arith.addf %438, %440 : vector<16x32xf32>
    %442 = vector.shape_cast %441 : vector<16x32xf32> to vector<2x8x32xf32>
    %cst_152 = arith.constant dense<0xFF800000> : vector<2x32xf32>
    %443 = vector.multi_reduction <maximumf>, %442, %cst_152 [1] : vector<2x8x32xf32> to vector<2x32xf32>
    %c0_153 = arith.constant 0 : index
    %c0_154 = arith.constant 0 : index
    %444 = vector.load %arg5[%c0_153, %c0_154] : memref<2x32xf32, #tpu.memory_space<vmem>>, vector<2x32xf32>
    tpu.vector_store %arg5[%c0_153, %c0_154], %443 {strides = array<i32>} : memref<2x32xf32, #tpu.memory_space<vmem>>, vector<2x32xf32>,
    return
  }
  func.func @transform_0(%arg0: i32) -> (i32, i32) {
    %c0_i32 = arith.constant 0 : i32
    %c0_i32_0 = arith.constant 0 : i32
    return %arg0, %c0_i32 : i32, i32
  }
  func.func @transform_1(%arg0: i32) -> (i32, i32) {
    %c0_i32 = arith.constant 0 : i32
    %c0_i32_0 = arith.constant 0 : i32
    %c0_i32_1 = arith.constant 0 : i32
    return %c0_i32, %c0_i32_0 : i32, i32
  }
  func.func @transform_2(%arg0: i32) -> (i32, i32, i32) {
    %c0_i32 = arith.constant 0 : i32
    %c0_i32_0 = arith.constant 0 : i32
    %c0_i32_1 = arith.constant 0 : i32
    %c0_i32_2 = arith.constant 0 : i32
    return %c0_i32, %c0_i32_0, %c0_i32_1 : i32, i32, i32
  }
  func.func @transform_3(%arg0: i32) -> (i32, i32) {
    %c0_i32 = arith.constant 0 : i32
    %c0_i32_0 = arith.constant 0 : i32
    %c0_i32_1 = arith.constant 0 : i32
    return %c0_i32, %c0_i32_0 : i32, i32
  }
  func.func @transform_4(%arg0: i32) -> (i32, i32) {
    %c0_i32 = arith.constant 0 : i32
    %c0_i32_0 = arith.constant 0 : i32
    return %arg0, %c0_i32 : i32, i32
  }
}

</mosaic_0001>

<bundles_post_ra>
// kernel: tpu_custom_call.1
= control target key start
LH: loop header
LB: loop body
LE: loop exit
PB: predicated region body
PF: predicated region fallthrough
CT: control target
= control target key end

     0   :  { %9 = vsyncpa [#allocation3], 0  ;;  %s2450_s0 = inlined_call_operand.hbm [shape: f32[16,10], index: 0, kind: input, shape index: {}]   ;;  %s2451_s1 = inlined_call_operand.hbm [shape: f32[10,32], index: 1, kind: input, shape index: {}]   ;;  %s2452_s2 = inlined_call_operand.hbm [shape: f32[10,32,32], index: 2, kind: input, shape index: {}]   ;;  %s2453_s3 = inlined_call_operand.hbm [shape: f32[31,32], index: 3, kind: input, shape index: {}]   ;;  %s2454_s4 = inlined_call_operand.hbm [shape: f32[2,32], index: 4, kind: output, shape index: {}]  }
   0x1   :  { %10 = vsyncpa [#allocation6], 0 }
   0x2   :  { %11 = vsyncpa [#allocation9], 0 }
   0x3   :  { %12 = vsyncpa [#allocation4], 0  ;;  %s2212_s15 = smov [#allocation5]   ;;  %s2213_s17 = smov [#allocation2]  }
   0x4   :  { %s30_s16 = sshll.u32 %s2212_s15, 4  ;;  %s18_s18 = sshll.u32 %s2213_s17, 4  ;;  %s31_s16 = int_to_ptr.vmem [resolvable:$true] %s30_s16  ;;  %s2249_s18 = int_to_ptr.vmem [resolvable:$true] %s18_s18 }
   0x5   :  { %s2094_s21 = scalar_lea.hbm %s2451_s1, 256 }
   0x6   :  { %p2095_p0 = scmp.ne.s32.totalorder %s2451_s1, %s2094_s21  ;;  %p2098_p1 = scmp.lt.u32.totalorder %s2094_s21, %s2451_s1 }
   0x8   :  { %p2100_p2 = pnand %p2098_p1, %p2095_p0 }
   0xa   :  { %2103 = shalt.err (!%p2100_p2)
}
   0xb   :  { %s2104_s26 = scalar_lea.vmem %s31_s16, 256  ;;  %p2109_p4 = scmp.lt.s32.totalorder %s31_s16, %s31_s16 }
   0xc   :  { %p2105_p3 = scmp.ne.s32.totalorder %s31_s16, %s2104_s26  ;;  %p2110_p5 = scmp.lt.s32.totalorder %s2104_s26, %s2104_s26 }
   0xe   :  { %p2111_p6 = por %p2110_p5, %p2109_p4 }
  0x10   :  { %p2112_p7 = pnand %p2111_p6, %p2105_p3 }
  0x12   :  { %2115 = shalt.err (!%p2112_p7)
}
  0x13   :  { %s2214_s27 = smov 128   ;;  %s2215_s28 = smov 8  }
  0x14   :  { %36 = dma.hbm_to_vmem [thread:$0]  %s2451_s1, 256, %s31_s16, [#allocation6], %s2214_s27, %s2214_s27, %s2215_s28  }
  0x15   :  { %s2116_s7 = scalar_lea.hbm %s2450_s0, 256 }
  0x16   :  { %p2117_p8 = scmp.ne.s32.totalorder %s2450_s0, %s2116_s7  ;;  %p2120_p9 = scmp.lt.u32.totalorder %s2116_s7, %s2450_s0 }
  0x18   :  { %p2122_p10 = pnand %p2120_p9, %p2117_p8 }
  0x1a   :  { %2125 = shalt.err (!%p2122_p10)
}
  0x1b   :  { %s2126_s12 = scalar_lea.vmem %s2249_s18, 256  ;;  %p2131_p12 = scmp.lt.s32.totalorder %s2249_s18, %s2249_s18 }
  0x1c   :  { %p2127_p11 = scmp.ne.s32.totalorder %s2249_s18, %s2126_s12  ;;  %p2132_p13 = scmp.lt.s32.totalorder %s2126_s12, %s2126_s12 }
  0x1e   :  { %p2133_p0 = por %p2132_p13, %p2131_p12 }
  0x20   :  { %p2134_p1 = pnand %p2133_p0, %p2127_p11 }
  0x22   :  { %2137 = shalt.err (!%p2134_p1)
}
  0x23   :  { %24 = dma.hbm_to_vmem [thread:$0]  %s2450_s0, 256, %s2249_s18, [#allocation3], %s2214_s27, %s2214_s27, %s2215_s28  }
  0x24   :  { %s2216_s14 = smov [#allocation7]   ;;  %s2217_s16 = smov [#allocation8]  }
  0x25   :  { %s42_s15 = sshll.u32 %s2216_s14, 4  ;;  %s54_s17 = sshll.u32 %s2217_s16, 4  ;;  %s43_s15 = int_to_ptr.vmem [resolvable:$true] %s42_s15  ;;  %s2286_s17 = int_to_ptr.vmem [resolvable:$true] %s54_s17 }
  0x26   :  { %s2138_s21 = scalar_lea.hbm %s2452_s2, 5120 }
  0x27   :  { %p2139_p2 = scmp.ne.s32.totalorder %s2452_s2, %s2138_s21  ;;  %p2142_p3 = scmp.lt.u32.totalorder %s2138_s21, %s2452_s2 }
  0x29   :  { %p2144_p4 = pnand %p2142_p3, %p2139_p2 }
  0x2b   :  { %2147 = shalt.err (!%p2144_p4)
}
  0x2c   :  { %s2148_s0 = scalar_lea.vmem %s43_s15, 5120  ;;  %p2153_p6 = scmp.lt.s32.totalorder %s43_s15, %s43_s15 }
  0x2d   :  { %p2149_p5 = scmp.ne.s32.totalorder %s43_s15, %s2148_s0  ;;  %p2154_p7 = scmp.lt.s32.totalorder %s2148_s0, %s2148_s0 }
  0x2f   :  { %p2155_p8 = por %p2154_p7, %p2153_p6 }
  0x31   :  { %p2156_p9 = pnand %p2155_p8, %p2149_p5 }
  0x33   :  { %2159 = shalt.err (!%p2156_p9)
}
  0x34   :  { %48 = dma.hbm_to_vmem [thread:$0]  %s2452_s2, 5120, %s43_s15, [#allocation6], %s2214_s27, %s2214_s27, %s2215_s28  }
  0x35   :  { %s2160_s5 = scalar_lea.hbm %s2453_s3, 512 }
  0x36   :  { %p2161_p10 = scmp.ne.s32.totalorder %s2453_s3, %s2160_s5  ;;  %p2164_p11 = scmp.lt.u32.totalorder %s2160_s5, %s2453_s3 }
  0x38   :  { %p2166_p12 = pnand %p2164_p11, %p2161_p10 }
  0x3a   :  { %2169 = shalt.err (!%p2166_p12)
}
  0x3b   :  { %s2170_s10 = scalar_lea.vmem %s2286_s17, 512  ;;  %p2175_p0 = scmp.lt.s32.totalorder %s2286_s17, %s2286_s17 }
  0x3c   :  { %p2171_p13 = scmp.ne.s32.totalorder %s2286_s17, %s2170_s10  ;;  %p2176_p1 = scmp.lt.s32.totalorder %s2170_s10, %s2170_s10 }
  0x3e   :  { %p2177_p2 = por %p2176_p1, %p2175_p0 }
  0x40   :  { %p2178_p3 = pnand %p2177_p2, %p2171_p13 }
  0x42   :  { %2181 = shalt.err (!%p2178_p3)
}
  0x43   :  { %60 = dma.hbm_to_vmem [thread:$0]  %s2453_s3, 512, %s2286_s17, [#allocation9], %s2214_s27, %s2214_s27, %s2215_s28  }
  0x44   :  { %2204 = dma.done.wait [#allocation3], 256  }
  0x45   :  { %2205 = vsyncadd [#allocation3], 4294967040 }
  0x46   :  { %2206 = dma.done.wait [#allocation6], 5376  }
  0x47   :  { %2207 = vsyncadd [#allocation6], 4294961920 }
  0x48   :  { %2208 = dma.done.wait [#allocation9], 512  }
  0x49   :  { %2209 = vsyncadd [#allocation9], 4294966784  ;;  %vm91_vm0 = vcmask 1041408   ;;  %vm84_vm1 = vcmask 80896   ;;  %vm2218_vm2 = vmmov 1   ;;  %v75_v0 = vld [vmem:[#allocation5] sm:$0xff] }
  0x4a   :  { %vm1957_vm3 = vmpackc.low %vm91_vm0, %vm2218_vm2  ;;  %v76_v1 = vld [vmem:[#allocation5 + $0x8] sm:$0x3]  ;;  %v73_v2 = vld [vmem:[#allocation2] sm:$0xff]  ;;  %vm170_vm4 = vcmask 261120   ;;  %vm2220_vm5 = vmmov 0   ;;  %vm516_vm6 = vcmask 1041409  }
  0x4b   :  { %v1956_v3 = vpack.c.bf16 %v76_v1, %v75_v0  ;;  %1843 = vmatprep.mubr.msk.f32.mxu0 %vm84_vm1, %v73_v2  ;;  %v74_v4 = vld [vmem:[#allocation2 + $0x8] sm:$0xff]  ;;  %v1725_v5 = vld [vmem:[#allocation8] ss:$0 sm:$0xff]  ;;  %v220_v18 = vld [vmem:[#allocation7 + $0x10] sm:$0xff]  ;;  %s2223_s3 = smov [#allocation10]   ;;  %vm1706_vm7 = vcmask 254976  }
  0x4c   :  { %v218_v16 = vld [vmem:[#allocation7] sm:$0xff]  ;;  %v219_v17 = vld [vmem:[#allocation7 + $0x8] sm:$0xff]  ;;  %v221_v20 = vld [vmem:[#allocation7 + $0x18] sm:$0xff]  ;;  %s1714_s27 = sshll.u32 %s2223_s3, 4  ;;  %s1715_s27 = int_to_ptr.vmem [resolvable:$true] %s1714_s27 }
  0x4d   :  { %1958 = vmatprep.subr.msk.bf16.mxu0 %vm1957_vm3, %v1956_v3  ;;  %v1962_v19 = vpack.c.bf16 %v219_v17, %v218_v16  ;;  %v1966_v21 = vpack.c.bf16 %v221_v20, %v220_v18  ;;  %v1729_v40 = vld [vmem:[#allocation8 + $0x1] ss:$0 sm:$0xff]  ;;  %v1730_v42 = vld [vmem:[#allocation8 + $0x2] ss:$0 sm:$0xff]  ;;  %v1731_v52 = vld [vmem:[#allocation8 + $0x3] ss:$0 sm:$0xff]  ;;  %p2187_p5 = scmp.lt.s32.totalorder %s1715_s27, %s1715_s27 }
  0x4e   :  { %1961 = vmatpush3.bf16.msk.msra.mxu0 %vm1957_vm3, %v1956_v3  ;;  %v357_v63 = vld [vmem:[#allocation7 + $0x20] sm:$0xff]  ;;  %v358_v0 = vld [vmem:[#allocation7 + $0x28] sm:$0xff]  ;;  %v359_v1 = vld [vmem:[#allocation7 + $0x30] sm:$0xff]  ;;  %s2182_s28 = scalar_lea.vmem %s1715_s27, 32 }
  0x4f   :  { %1963 = vmatprep.subr.bf16.mxu1 %v1962_v19  ;;  %v1970_v2 = vpack.c.bf16 %v358_v0, %v357_v63  ;;  %v360_v3 = vld [vmem:[#allocation7 + $0x38] sm:$0xff]  ;;  %p2183_p4 = scmp.ne.s32.totalorder %s1715_s27, %s2182_s28  ;;  %p2188_p6 = scmp.lt.s32.totalorder %s2182_s28, %s2182_s28 }
  0x50   :  { %1965 = vmatpush3.bf16.msra.mxu1 %v1962_v19 }
  0x51   :  { %1844 = vmatmul.mubr.msk.f32.vlgmr.msra.gmra.mrb[0].mxu0 %vm84_vm1, %v74_v4  ;;  %1967 = vmatprep.subr.bf16.mxu1 %v1966_v21  ;;  %v1974_v4 = vpack.c.bf16 %v360_v3, %v359_v1  ;;  %p2189_p7 = por %p2188_p6, %p2187_p5 }
  0x52   :  { %1971 = vmatprep.subr.bf16.mxu0 %v1970_v2 }
  0x53   :  { %1973 = vmatpush3.bf16.msra.mxu0 %v1970_v2  ;;  %p2190_p8 = pnand %p2189_p7, %p2183_p4 }
  0x54   :  { %1969 = vmatpush3.bf16.msra.mxu1 %v1966_v21  ;;  %1975 = vmatprep.subr.bf16.mxu0 %v1974_v4 }
  0x57   :  { %1977 = vmatpush3.bf16.msra.mxu0 %v1974_v4 }
 0x124   :  { %v1845_v6 = vpop.f32.mrb[0].mxu0 }
 0x125   :  { %v161_v7 = vpop.f32.mrb[1].mxu0  ;;  %v167_v8 = vadd.f32 %v1845_v6, %v1725_v5 }
 0x126   :  { %v162_v9 = vadd.f32 %v1725_v5, %v161_v7 }
 0x127   :  { %v181_v13 = vmul.f32 %v167_v8, %v167_v8  ;;  %v174_v14 = vsel %vm170_vm4, %v167_v8, 0.0 }
 0x128   :  { %v171_v10 = vsel %vm170_vm4, %v162_v9, 0.0  ;;  %v180_v11 = vmul.f32 %v162_v9, %v162_v9 }
 0x129   :  { %172 = vadd.xlane.f32.xlu0 %v171_v10  ;;  %v185_v15 = vsel %vm170_vm4, %v181_v13, 0.0 }
 0x12a   :  { %v182_v12 = vsel %vm170_vm4, %v180_v11, 0.0 }
 0x12b   :  { %183 = vadd.xlane.f32.xlu1 %v182_v12 }
 0x12d   :  { %175 = vadd.xlane.f32.xlu0 %v174_v14 }
 0x12f   :  { %186 = vadd.xlane.f32.xlu1 %v185_v15 }
 0x1b6   :  { %v173_v22 = vpop.xlane.xlu0 %172 }
 0x1b7   :  { %v178_v23 = vmul.f32 0.03125, %v173_v22 }
 0x1b8   :  { %v184_v24 = vpop.xlane.xlu1 %183 }
 0x1b9   :  { %v190_v25 = vmul.f32 %v178_v23, %v178_v23  ;;  %v188_v26 = vmul.f32 0.03125, %v184_v24  ;;  %v196_v38 = vsub.f32 %v162_v9, %v178_v23  ;;  %v1734_v24 = vld [vmem:[#allocation8 + $0x4] ss:$0 sm:$0xff] }
 0x1ba   :  { %v176_v27 = vpop.xlane.xlu0 %175 }
 0x1bb   :  { %v192_v28 = vsub.f32 %v188_v26, %v190_v25  ;;  %v179_v29 = vmul.f32 0.03125, %v176_v27  ;;  %v1735_v27 = vld [vmem:[#allocation8 + $0x5] ss:$0 sm:$0xff] }
 0x1bc   :  { %v187_v30 = vpop.xlane.xlu1 %186 }
 0x1bd   :  { %v194_v31 = vmax.f32 %v192_v28, 0.0  ;;  %v191_v32 = vmul.f32 %v179_v29, %v179_v29  ;;  %v189_v33 = vmul.f32 0.03125, %v187_v30  ;;  %v197_v43 = vsub.f32 %v167_v8, %v179_v29 }
 0x1bf   :  { %v198_v34 = vadd.f32 1e-05, %v194_v31  ;;  %v193_v35 = vsub.f32 %v189_v33, %v191_v32 }
 0x1c1   :  { %2050 = vrsqrt.f32 %v198_v34  ;;  %v195_v36 = vmax.f32 %v193_v35, 0.0  ;;  %v1736_v35 = vld [vmem:[#allocation8 + $0x6] ss:$0 sm:$0xff] }
 0x1c3   :  { %v199_v37 = vadd.f32 1e-05, %v195_v36 }
 0x1c5   :  { %2052 = vrsqrt.f32 %v199_v37 }
 0x1cb   :  { %v2051_v39 = vpop.eup %2050 }
 0x1cc   :  { %v202_v41 = vmul.f32 %v2051_v39, %v196_v38 }
 0x1ce   :  { %v208_v44 = vmul.f32 %v1729_v40, %v202_v41 }
 0x1cf   :  { %v2053_v45 = vpop.eup %2052 }
 0x1d0   :  { %v203_v46 = vmul.f32 %v2053_v45, %v197_v43  ;;  %v2327_v47 = vadd.f32 %v1730_v42, %v208_v44 }
 0x1d2   :  { %v209_v48 = vmul.f32 %v1729_v40, %v203_v46  ;;  %v216_v49 = vmax.f32 %v2327_v47, 0.0  ;;  %v591_v46 = vld [vmem:[#allocation7 + $0x40] sm:$0xff]  ;;  %v957_v47 = vld [vmem:[#allocation7 + $0xb8] sm:$0xff] }
 0x1d4   :  { %v2330_v50 = vadd.f32 %v1730_v42, %v209_v48  ;;  %1854 = vmatprep.mubr.msk.f32.mxu1 %vm170_vm4, %v216_v49  ;;  %v592_v48 = vld [vmem:[#allocation7 + $0x48] sm:$0xff] }
 0x1d6   :  { %v217_v51 = vmax.f32 %v2330_v50, 0.0  ;;  %v955_v50 = vld [vmem:[#allocation7 + $0xa8] sm:$0xff] }
 0x1d8   :  { %1855 = vmatmul.mubr.msk.f32.vlgmr.msra.gmra.mrb[0].mxu1 %vm170_vm4, %v217_v51 }
 0x2ab   :  { %v1856_v53 = vpop.f32.mrb[0].mxu1 }
 0x2ac   :  { %v307_v54 = vadd.f32 %v1856_v53, %v1731_v52  ;;  %v301_v55 = vpop.f32.mrb[1].mxu1  ;;  %v1984_v53 = vpack.c.bf16 %v592_v48, %v591_v46  ;;  %v2222_v48 = vmov 1966171168  }
 0x2ad   :  { %v302_v56 = vadd.f32 %v1731_v52, %v301_v55  ;;  %v593_v52 = vld [vmem:[#allocation7 + $0x50] sm:$0xff] }
 0x2ae   :  { %v313_v57 = vsel %vm170_vm4, %v307_v54, 0.0  ;;  %v319_v58 = vmul.f32 %v307_v54, %v307_v54  ;;  %1985 = vmatprep.subr.bf16.mxu0 %v1984_v53 }
 0x2af   :  { %314 = vadd.xlane.f32.xlu1 %v313_v57  ;;  %v310_v59 = vsel %vm170_vm4, %v302_v56, 0.0  ;;  %v318_v60 = vmul.f32 %v302_v56, %v302_v56  ;;  %v511_v57 = vld [vmem:[#allocation7 + $0x68] sm:$0xff] }
 0x2b0   :  { %311 = vadd.xlane.f32.xlu0 %v310_v59  ;;  %v323_v61 = vsel %vm170_vm4, %v319_v58, 0.0  ;;  %v512_v59 = vld [vmem:[#allocation7 + $0x70] sm:$0xff] }
 0x2b1   :  { %v320_v62 = vsel %vm170_vm4, %v318_v60, 0.0  ;;  %v513_v60 = vld [vmem:[#allocation7 + $0x78] sm:$0xff] }
 0x2b2   :  { %v1982_v63 = vpack.c.bf16 %v513_v60, %v512_v59 }
 0x2b3   :  { %324 = vadd.xlane.f32.xlu1 %v323_v61  ;;  %v2219_v61 = vmov 0.0|0.0  }
 0x2b4   :  { %321 = vadd.xlane.f32.xlu0 %v320_v62  ;;  %1978 = vmatprep.subr.bf16.mxu1 %v2219_v61  ;;  %v2221_v62 = vmov 0.0  }
 0x2b5   :  { %1876 = vmatprep.mubr.msk.f32.mxu1 %vm2220_vm5, %v2221_v62 }
 0x33c   :  { %v315_v5 = vpop.xlane.xlu1 %314 }
 0x33d   :  { %v317_v6 = vmul.f32 0.03125, %v315_v5  ;;  %v312_v7 = vpop.xlane.xlu0 %311 }
 0x33e   :  { %v316_v8 = vmul.f32 0.03125, %v312_v7 }
 0x33f   :  { %v329_v10 = vmul.f32 %v317_v6, %v317_v6  ;;  %v335_v21 = vsub.f32 %v307_v54, %v317_v6  ;;  %v594_v54 = vld [vmem:[#allocation7 + $0x58] sm:$0xff] }
 0x340   :  { %v325_v9 = vpop.xlane.xlu1 %324  ;;  %v328_v13 = vmul.f32 %v316_v8, %v316_v8  ;;  %v334_v23 = vsub.f32 %v302_v56, %v316_v8  ;;  %v1988_v55 = vpack.c.bf16 %v594_v54, %v593_v52  ;;  %v510_v56 = vld [vmem:[#allocation7 + $0x60] sm:$0xff]  ;;  %v678_v52 = vunpack.c.l.s4 %v2222_v48 }
 0x341   :  { %v327_v11 = vmul.f32 0.03125, %v325_v9  ;;  %v322_v12 = vpop.xlane.xlu0 %321  ;;  %v1979_v58 = vpack.c.bf16 %v511_v57, %v510_v56 }
 0x342   :  { %v326_v14 = vmul.f32 0.03125, %v322_v12  ;;  %v679_v54 = vunpack.c.0.s8 %v678_v52 }
 0x343   :  { %v331_v15 = vsub.f32 %v327_v11, %v329_v10  ;;  %1980 = vmatpush3.bf16.msra.mxu1 %v1979_v58 }
 0x344   :  { %v330_v16 = vsub.f32 %v326_v14, %v328_v13  ;;  %1981 = vmatprep.subr.bf16.mxu1 %v2219_v61 }
 0x345   :  { %v333_v17 = vmax.f32 %v331_v15, 0.0 }
 0x346   :  { %v332_v18 = vmax.f32 %v330_v16, 0.0 }
 0x347   :  { %v337_v19 = vadd.f32 1e-05, %v333_v17  ;;  %1983 = vmatpush3.bf16.msra.mxu1 %v1982_v63 }
 0x348   :  { %v336_v20 = vadd.f32 1e-05, %v332_v18 }
 0x349   :  { %2054 = vrsqrt.f32 %v337_v19  ;;  %v1739_v19 = vld [vmem:[#allocation8 + $0x7] ss:$0 sm:$0xff] }
 0x34a   :  { %2056 = vrsqrt.f32 %v336_v20 }
 0x353   :  { %v2055_v22 = vpop.eup %2054 }
 0x354   :  { %v2057_v25 = vpop.eup %2056  ;;  %v341_v26 = vmul.f32 %v2055_v22, %v335_v21  ;;  %v1740_v22 = vld [vmem:[#allocation8 + $0x8] ss:$0 sm:$0xff] }
 0x355   :  { %v340_v28 = vmul.f32 %v2057_v25, %v334_v23 }
 0x356   :  { %v347_v29 = vmul.f32 %v1734_v24, %v341_v26 }
 0x357   :  { %v346_v30 = vmul.f32 %v1734_v24, %v340_v28 }
 0x358   :  { %v353_v31 = vadd.f32 %v1735_v27, %v347_v29 }
 0x359   :  { %v352_v32 = vadd.f32 %v1735_v27, %v346_v30 }
 0x35a   :  { %v355_v34 = vmax.f32 %v353_v31, 0.0 }
 0x35b   :  { %v354_v33 = vmax.f32 %v352_v32, 0.0 }
 0x35d   :  { %1865 = vmatprep.mubr.msk.f32.mxu0 %vm170_vm4, %v354_v33 }
 0x35e   :  { %1866 = vmatmul.mubr.msk.f32.vlgmr.msra.gmra.mrb[2].mxu0 %vm170_vm4, %v355_v34 }
 0x35f   :  { %1987 = vmatpush3.bf16.msra.mxu0 %v1984_v53  ;;  %v680_v53 = vlaneseq }
 0x360   :  { %1989 = vmatprep.subr.bf16.mxu0 %v1988_v55 }
 0x363   :  { %1991 = vmatpush3.bf16.msra.mxu0 %v1988_v55  ;;  %v681_v55 = vshrl.u32 %v680_v53, 7 }
 0x365   :  { %v2359_v56 = vsub.s32 %v679_v54, %v681_v55  ;;  %v2362_v59 = vsub.s32 0, %v681_v55  ;;  %v1747_v55 = vld [vmem:[#allocation8 + $0xc] ss:$0 sm:$0xff] }
 0x431   :  { %v1867_v36 = vpop.f32.mrb[2].mxu0 }
 0x432   :  { %v446_v37 = vadd.f32 %v1867_v36, %v1736_v35  ;;  %v440_v38 = vpop.f32.mrb[3].mxu0 }
 0x433   :  { %v441_v39 = vadd.f32 %v1736_v35, %v440_v38 }
 0x434   :  { %v452_v40 = vsel %vm170_vm4, %v446_v37, 0.0  ;;  %v458_v41 = vmul.f32 %v446_v37, %v446_v37 }
 0x435   :  { %453 = vadd.xlane.f32.xlu1 %v452_v40  ;;  %v449_v42 = vsel %vm170_vm4, %v441_v39, 0.0  ;;  %v457_v43 = vmul.f32 %v441_v39, %v441_v39 }
 0x436   :  { %450 = vadd.xlane.f32.xlu0 %v449_v42  ;;  %v462_v44 = vsel %vm170_vm4, %v458_v41, 0.0 }
 0x437   :  { %v459_v45 = vsel %vm170_vm4, %v457_v43, 0.0 }
 0x439   :  { %463 = vadd.xlane.f32.xlu1 %v462_v44 }
 0x43a   :  { %460 = vadd.xlane.f32.xlu0 %v459_v45 }
 0x4c2   :  { %v454_v0 = vpop.xlane.xlu1 %453 }
 0x4c3   :  { %v456_v1 = vmul.f32 0.03125, %v454_v0  ;;  %v451_v2 = vpop.xlane.xlu0 %450 }
 0x4c4   :  { %v455_v3 = vmul.f32 0.03125, %v451_v2 }
 0x4c5   :  { %v468_v5 = vmul.f32 %v456_v1, %v456_v1  ;;  %v474_v16 = vsub.f32 %v446_v37, %v456_v1 }
 0x4c6   :  { %v464_v4 = vpop.xlane.xlu1 %463  ;;  %v467_v8 = vmul.f32 %v455_v3, %v455_v3  ;;  %v473_v18 = vsub.f32 %v441_v39, %v455_v3  ;;  %v1744_v3 = vld [vmem:[#allocation8 + $0x9] ss:$0 sm:$0xff] }
 0x4c7   :  { %v466_v6 = vmul.f32 0.03125, %v464_v4  ;;  %v461_v7 = vpop.xlane.xlu0 %460 }
 0x4c8   :  { %v465_v9 = vmul.f32 0.03125, %v461_v7 }
 0x4c9   :  { %v470_v10 = vsub.f32 %v466_v6, %v468_v5 }
 0x4ca   :  { %v469_v11 = vsub.f32 %v465_v9, %v467_v8 }
 0x4cb   :  { %v472_v12 = vmax.f32 %v470_v10, 0.0 }
 0x4cc   :  { %v471_v13 = vmax.f32 %v469_v11, 0.0 }
 0x4cd   :  { %v476_v14 = vadd.f32 1e-05, %v472_v12 }
 0x4ce   :  { %v475_v15 = vadd.f32 1e-05, %v471_v13 }
 0x4cf   :  { %2058 = vrsqrt.f32 %v476_v14 }
 0x4d0   :  { %2060 = vrsqrt.f32 %v475_v15  ;;  %v767_v15 = vld [vmem:[#allocation7 + $0x80] sm:$0xff] }
 0x4d9   :  { %v2059_v17 = vpop.eup %2058 }
 0x4da   :  { %v2061_v20 = vpop.eup %2060  ;;  %v480_v21 = vmul.f32 %v2059_v17, %v474_v16  ;;  %v768_v16 = vld [vmem:[#allocation7 + $0x88] sm:$0xff]  ;;  %v769_v17 = vld [vmem:[#allocation7 + $0x90] sm:$0xff] }
 0x4db   :  { %v479_v23 = vmul.f32 %v2061_v20, %v473_v18  ;;  %v1992_v18 = vpack.c.bf16 %v768_v16, %v767_v15 }
 0x4dc   :  { %v486_v24 = vmul.f32 %v1739_v19, %v480_v21 }
 0x4dd   :  { %v485_v25 = vmul.f32 %v1739_v19, %v479_v23  ;;  %v770_v19 = vld [vmem:[#allocation7 + $0x98] sm:$0xff]  ;;  %1993 = vmatprep.subr.bf16.mxu1 %v1992_v18 }
 0x4de   :  { %v492_v26 = vadd.f32 %v1740_v22, %v486_v24  ;;  %v1996_v20 = vpack.c.bf16 %v770_v19, %v769_v17 }
 0x4df   :  { %v491_v27 = vadd.f32 %v1740_v22, %v485_v25 }
 0x4e0   :  { %v494_v28 = vmax.f32 %v492_v26, 0.0 }
 0x4e1   :  { %v493_v29 = vmax.f32 %v491_v27, 0.0 }
 0x4e2   :  { %v502_v30 = vsel %vm170_vm4, %v494_v28, -inf }
 0x4e3   :  { %v495_v31 = vsel %vm170_vm4, %v493_v29, -inf  ;;  %v503_v32 = vrot.slane %v502_v30, 4  ;;  %1887 = vmatprep.mubr.msk.f32.mxu0 %vm170_vm4, %v493_v29 }
 0x4e4   :  { %v496_v33 = vrot.slane %v495_v31, 4  ;;  %1888 = vmatmul.mubr.msk.f32.vlgmr.msra.gmra.mrb[4].mxu0 %vm170_vm4, %v494_v28 }
 0x4e5   :  { %v504_v34 = vmax.f32 %v502_v30, %v503_v32 }
 0x4e6   :  { %v497_v35 = vmax.f32 %v495_v31, %v496_v33 }
 0x4e7   :  { %v505_v36 = vrot.slane %v504_v34, 2 }
 0x4e8   :  { %v498_v37 = vrot.slane %v497_v35, 2 }
 0x4e9   :  { %v506_v38 = vmax.f32 %v504_v34, %v505_v36 }
 0x4ea   :  { %v499_v39 = vmax.f32 %v497_v35, %v498_v37 }
 0x4eb   :  { %v507_v40 = vrot.slane %v506_v38, 1 }
 0x4ec   :  { %v500_v41 = vrot.slane %v499_v39, 1 }
 0x4ed   :  { %v508_v42 = vmax.f32 %v506_v38, %v507_v40 }
 0x4ee   :  { %v501_v43 = vmax.f32 %v499_v39, %v500_v41  ;;  %v1745_v39 = vld [vmem:[#allocation8 + $0xa] ss:$0 sm:$0xff] }
 0x4f0   :  { %v517_v44 = vsel %vm516_vm6, %v508_v42, %v501_v43  ;;  %v1746_v43 = vld [vmem:[#allocation8 + $0xb] ss:$0 sm:$0xff] }
 0x4f1   :  { %1877 = vmatmul.mubr.msk.f32.vlgmr.msra.gmra.mrb[2].mxu1 %vm170_vm4, %v517_v44 }
 0x4f2   :  { %1995 = vmatpush3.bf16.msra.mxu1 %v1992_v18 }
 0x4f3   :  { %1997 = vmatprep.subr.bf16.mxu1 %v1996_v20 }
 0x4f6   :  { %1999 = vmatpush3.bf16.msra.mxu1 %v1996_v20 }
 0x5b7   :  { %v1889_v45 = vpop.f32.mrb[4].mxu0 }
 0x5b8   :  { %v667_v46 = vpop.f32.mrb[5].mxu0 }
 0x5c4   :  { %v586_v57 = vpop.f32.mrb[2].mxu1 }
 0x5c5   :  { %v683_v58 = vrot.slane %v586_v57, %v2359_v56  ;;  %v1878_v60 = vpop.f32.mrb[3].mxu1 }
 0x5c7   :  { %v684_v63 = vcombine.high %v683_v58, %v683_v58  ;;  %v691_v0 = vrot.slane %v683_v58, %v2359_v56 }
 0x5c9   :  { %v698_v1 = vrot.slane %v684_v63, %v2359_v56  ;;  %v702_v2 = vrot.slane %v691_v0, %v2362_v59 }
 0x5cb   :  { %v706_v4 = vrot.slane %v698_v1, %v2362_v59  ;;  %v709_v5 = vadd.f32 %v702_v2, %v667_v46 }
 0x5cd   :  { %v716_v6 = vadd.f32 %v1744_v3, %v709_v5  ;;  %v710_v7 = vadd.f32 %v1889_v45, %v706_v4 }
 0x5cf   :  { %v720_v8 = vsel %vm170_vm4, %v716_v6, 0.0  ;;  %v717_v9 = vadd.f32 %v1744_v3, %v710_v7  ;;  %v728_v10 = vmul.f32 %v716_v6, %v716_v6 }
 0x5d0   :  { %721 = vadd.xlane.f32.xlu0 %v720_v8 }
 0x5d1   :  { %v723_v11 = vsel %vm170_vm4, %v717_v9, 0.0  ;;  %v729_v12 = vmul.f32 %v717_v9, %v717_v9  ;;  %v730_v13 = vsel %vm170_vm4, %v728_v10, 0.0 }
 0x5d2   :  { %724 = vadd.xlane.f32.xlu1 %v723_v11 }
 0x5d3   :  { %v733_v14 = vsel %vm170_vm4, %v729_v12, 0.0 }
 0x5d4   :  { %731 = vadd.xlane.f32.xlu0 %v730_v13 }
 0x5d6   :  { %734 = vadd.xlane.f32.xlu1 %v733_v14 }
 0x65d   :  { %v722_v21 = vpop.xlane.xlu0 %721 }
 0x65e   :  { %v726_v22 = vmul.f32 0.03125, %v722_v21 }
 0x65f   :  { %v725_v23 = vpop.xlane.xlu1 %724 }
 0x660   :  { %v727_v24 = vmul.f32 0.03125, %v725_v23  ;;  %v738_v26 = vmul.f32 %v726_v22, %v726_v22  ;;  %v744_v37 = vsub.f32 %v716_v6, %v726_v22 }
 0x661   :  { %v732_v25 = vpop.xlane.xlu0 %731 }
 0x662   :  { %v736_v27 = vmul.f32 0.03125, %v732_v25  ;;  %v739_v29 = vmul.f32 %v727_v24, %v727_v24  ;;  %v745_v40 = vsub.f32 %v717_v9, %v727_v24  ;;  %v1750_v25 = vld [vmem:[#allocation8 + $0xd] ss:$0 sm:$0xff] }
 0x663   :  { %v735_v28 = vpop.xlane.xlu1 %734 }
 0x664   :  { %v740_v30 = vsub.f32 %v736_v27, %v738_v26  ;;  %v737_v31 = vmul.f32 0.03125, %v735_v28  ;;  %v1751_v28 = vld [vmem:[#allocation8 + $0xe] ss:$0 sm:$0xff] }
 0x666   :  { %v742_v32 = vmax.f32 %v740_v30, 0.0  ;;  %v741_v33 = vsub.f32 %v737_v31, %v739_v29 }
 0x668   :  { %v746_v34 = vadd.f32 1e-05, %v742_v32  ;;  %v743_v35 = vmax.f32 %v741_v33, 0.0 }
 0x66a   :  { %2062 = vrsqrt.f32 %v746_v34  ;;  %v747_v36 = vadd.f32 1e-05, %v743_v35 }
 0x66c   :  { %2064 = vrsqrt.f32 %v747_v36 }
 0x674   :  { %v2063_v38 = vpop.eup %2062 }
 0x675   :  { %v750_v41 = vmul.f32 %v2063_v38, %v744_v37 }
 0x676   :  { %v2065_v42 = vpop.eup %2064 }
 0x677   :  { %v751_v44 = vmul.f32 %v2065_v42, %v745_v40  ;;  %v756_v45 = vmul.f32 %v1745_v39, %v750_v41 }
 0x679   :  { %v757_v46 = vmul.f32 %v1745_v39, %v751_v44  ;;  %v762_v48 = vadd.f32 %v1746_v43, %v756_v45  ;;  %v954_v44 = vld [vmem:[#allocation7 + $0xa0] sm:$0xff] }
 0x67a   :  { %v2000_v45 = vpack.c.bf16 %v955_v50, %v954_v44 }
 0x67b   :  { %v763_v52 = vadd.f32 %v1746_v43, %v757_v46  ;;  %v764_v53 = vmax.f32 %v762_v48, 0.0 }
 0x67c   :  { %2001 = vmatprep.subr.bf16.mxu0 %v2000_v45 }
 0x67d   :  { %v765_v54 = vmax.f32 %v763_v52, 0.0  ;;  %1898 = vmatprep.mubr.msk.f32.mxu1 %vm170_vm4, %v764_v53  ;;  %2003 = vmatpush3.bf16.msra.mxu0 %v2000_v45 }
 0x67f   :  { %1899 = vmatmul.mubr.msk.f32.vlgmr.msra.gmra.mrb[4].mxu1 %vm170_vm4, %v765_v54 }
 0x752   :  { %v1900_v57 = vpop.f32.mrb[4].mxu1 }
 0x753   :  { %v856_v58 = vadd.f32 %v1900_v57, %v1747_v55  ;;  %v850_v60 = vpop.f32.mrb[5].mxu1 }
 0x754   :  { %v851_v63 = vadd.f32 %v1747_v55, %v850_v60 }
 0x755   :  { %v862_v0 = vsel %vm170_vm4, %v856_v58, 0.0  ;;  %v868_v1 = vmul.f32 %v856_v58, %v856_v58 }
 0x756   :  { %863 = vadd.xlane.f32.xlu1 %v862_v0  ;;  %v859_v2 = vsel %vm170_vm4, %v851_v63, 0.0  ;;  %v867_v3 = vmul.f32 %v851_v63, %v851_v63 }
 0x757   :  { %860 = vadd.xlane.f32.xlu0 %v859_v2  ;;  %v872_v4 = vsel %vm170_vm4, %v868_v1, 0.0 }
 0x758   :  { %v869_v5 = vsel %vm170_vm4, %v867_v3, 0.0 }
 0x75a   :  { %873 = vadd.xlane.f32.xlu1 %v872_v4 }
 0x75b   :  { %870 = vadd.xlane.f32.xlu0 %v869_v5 }
 0x7e3   :  { %v864_v6 = vpop.xlane.xlu1 %863 }
 0x7e4   :  { %v866_v7 = vmul.f32 0.03125, %v864_v6  ;;  %v861_v8 = vpop.xlane.xlu0 %860 }
 0x7e5   :  { %v865_v9 = vmul.f32 0.03125, %v861_v8 }
 0x7e6   :  { %v878_v11 = vmul.f32 %v866_v7, %v866_v7  ;;  %v884_v22 = vsub.f32 %v856_v58, %v866_v7 }
 0x7e7   :  { %v874_v10 = vpop.xlane.xlu1 %873  ;;  %v877_v14 = vmul.f32 %v865_v9, %v865_v9  ;;  %v883_v24 = vsub.f32 %v851_v63, %v865_v9  ;;  %v1752_v9 = vld [vmem:[#allocation8 + $0xf] ss:$0 sm:$0xff] }
 0x7e8   :  { %v876_v12 = vmul.f32 0.03125, %v874_v10  ;;  %v871_v13 = vpop.xlane.xlu0 %870 }
 0x7e9   :  { %v875_v15 = vmul.f32 0.03125, %v871_v13  ;;  %v1753_v13 = vld [vmem:[#allocation8 + $0x10] ss:$0 sm:$0xff] }
 0x7ea   :  { %v880_v16 = vsub.f32 %v876_v12, %v878_v11 }
 0x7eb   :  { %v879_v17 = vsub.f32 %v875_v15, %v877_v14 }
 0x7ec   :  { %v882_v18 = vmax.f32 %v880_v16, 0.0 }
 0x7ed   :  { %v881_v19 = vmax.f32 %v879_v17, 0.0 }
 0x7ee   :  { %v886_v20 = vadd.f32 1e-05, %v882_v18  ;;  %v1754_v18 = vld [vmem:[#allocation8 + $0x11] ss:$0 sm:$0xff] }
 0x7ef   :  { %v885_v21 = vadd.f32 1e-05, %v881_v19 }
 0x7f0   :  { %2066 = vrsqrt.f32 %v886_v20 }
 0x7f1   :  { %2068 = vrsqrt.f32 %v885_v21 }
 0x7fa   :  { %v2067_v23 = vpop.eup %2066 }
 0x7fb   :  { %v2069_v26 = vpop.eup %2068  ;;  %v890_v27 = vmul.f32 %v2067_v23, %v884_v22 }
 0x7fc   :  { %v889_v29 = vmul.f32 %v2069_v26, %v883_v24 }
 0x7fd   :  { %v896_v30 = vmul.f32 %v1750_v25, %v890_v27 }
 0x7fe   :  { %v895_v31 = vmul.f32 %v1750_v25, %v889_v29  ;;  %v1094_v29 = vld [vmem:[#allocation7 + $0xc8] sm:$0xff] }
 0x7ff   :  { %v902_v32 = vadd.f32 %v1751_v28, %v896_v30  ;;  %v1095_v30 = vld [vmem:[#allocation7 + $0xd0] sm:$0xff] }
 0x800   :  { %v901_v33 = vadd.f32 %v1751_v28, %v895_v31 }
 0x801   :  { %v904_v34 = vmax.f32 %v902_v32, 0.0  ;;  %v1096_v32 = vld [vmem:[#allocation7 + $0xd8] sm:$0xff] }
 0x802   :  { %v903_v35 = vmax.f32 %v901_v33, 0.0  ;;  %v2012_v33 = vpack.c.bf16 %v1096_v32, %v1095_v30 }
 0x803   :  { %v906_v36 = vadd.f32 %v904_v34, %v217_v51  ;;  %v956_v51 = vld [vmem:[#allocation7 + $0xb0] sm:$0xff] }
 0x804   :  { %v905_v37 = vadd.f32 %v903_v35, %v216_v49  ;;  %v2004_v49 = vpack.c.bf16 %v957_v47, %v956_v51 }
 0x805   :  { %v912_v38 = vsel %vm170_vm4, %v906_v36, 0.0  ;;  %v918_v39 = vmul.f32 %v906_v36, %v906_v36 }
 0x806   :  { %913 = vadd.xlane.f32.xlu1 %v912_v38  ;;  %v909_v40 = vsel %vm170_vm4, %v905_v37, 0.0  ;;  %v917_v41 = vmul.f32 %v905_v37, %v905_v37  ;;  %2005 = vmatprep.subr.bf16.mxu0 %v2004_v49 }
 0x807   :  { %910 = vadd.xlane.f32.xlu0 %v909_v40  ;;  %v922_v42 = vsel %vm170_vm4, %v918_v39, 0.0  ;;  %2007 = vmatpush3.bf16.msra.mxu0 %v2004_v49 }
 0x808   :  { %v919_v43 = vsel %vm170_vm4, %v917_v41, 0.0  ;;  %2016 = vmatprep.subr.bf16.mxu0 %v2219_v61 }
 0x80a   :  { %923 = vadd.xlane.f32.xlu1 %v922_v42 }
 0x80b   :  { %920 = vadd.xlane.f32.xlu0 %v919_v43 }
 0x893   :  { %v914_v46 = vpop.xlane.xlu1 %913 }
 0x894   :  { %v916_v48 = vmul.f32 0.03125, %v914_v46  ;;  %v911_v52 = vpop.xlane.xlu0 %910 }
 0x895   :  { %v915_v53 = vmul.f32 0.03125, %v911_v52 }
 0x896   :  { %v928_v55 = vmul.f32 %v916_v48, %v916_v48  ;;  %v934_v6 = vsub.f32 %v906_v36, %v916_v48 }
 0x897   :  { %v924_v54 = vpop.xlane.xlu1 %923  ;;  %v927_v60 = vmul.f32 %v915_v53, %v915_v53  ;;  %v933_v8 = vsub.f32 %v905_v37, %v915_v53  ;;  %v1757_v53 = vld [vmem:[#allocation8 + $0x12] ss:$0 sm:$0xff] }
 0x898   :  { %v926_v57 = vmul.f32 0.03125, %v924_v54  ;;  %v921_v58 = vpop.xlane.xlu0 %920 }
 0x899   :  { %v925_v63 = vmul.f32 0.03125, %v921_v58 }
 0x89a   :  { %v930_v0 = vsub.f32 %v926_v57, %v928_v55  ;;  %v1758_v57 = vld [vmem:[#allocation8 + $0x13] ss:$0 sm:$0xff] }
 0x89b   :  { %v929_v1 = vsub.f32 %v925_v63, %v927_v60 }
 0x89c   :  { %v932_v2 = vmax.f32 %v930_v0, 0.0 }
 0x89d   :  { %v931_v3 = vmax.f32 %v929_v1, 0.0 }
 0x89e   :  { %v936_v4 = vadd.f32 1e-05, %v932_v2 }
 0x89f   :  { %v935_v5 = vadd.f32 1e-05, %v931_v3 }
 0x8a0   :  { %2070 = vrsqrt.f32 %v936_v4  ;;  %v1759_v4 = vld [vmem:[#allocation8 + $0x14] ss:$0 sm:$0xff] }
 0x8a1   :  { %2072 = vrsqrt.f32 %v935_v5 }
 0x8aa   :  { %v2071_v7 = vpop.eup %2070 }
 0x8ab   :  { %v2073_v10 = vpop.eup %2072  ;;  %v940_v11 = vmul.f32 %v2071_v7, %v934_v6 }
 0x8ac   :  { %v939_v12 = vmul.f32 %v2073_v10, %v933_v8 }
 0x8ad   :  { %v946_v14 = vmul.f32 %v1752_v9, %v940_v11 }
 0x8ae   :  { %v945_v15 = vmul.f32 %v1752_v9, %v939_v12 }
 0x8af   :  { %v2389_v17 = vadd.f32 %v1753_v13, %v946_v14 }
 0x8b0   :  { %v2387_v16 = vadd.f32 %v1753_v13, %v945_v15  ;;  %v1326_v15 = vld [vmem:[#allocation7 + $0xe0] sm:$0xff] }
 0x8b2   :  { %1909 = vmatprep.mubr.msk.f32.mxu0 %vm170_vm4, %v2387_v16 }
 0x8b3   :  { %1910 = vmatmul.mubr.msk.f32.vlgmr.msra.gmra.mrb[6].mxu0 %vm170_vm4, %v2389_v17 }
 0x8b4   :  { %1931 = vmatprep.mubr.msk.f32.mxu0 %vm2220_vm5, %v2221_v62  ;;  %v1093_v62 = vld [vmem:[#allocation7 + $0xc0] sm:$0xff] }
 0x8b5   :  { %v2008_v31 = vpack.c.bf16 %v1094_v29, %v1093_v62 }
 0x8b7   :  { %2009 = vmatprep.subr.bf16.mxu1 %v2008_v31 }
 0x8b8   :  { %2011 = vmatpush3.bf16.msra.mxu1 %v2008_v31 }
 0x8b9   :  { %2013 = vmatprep.subr.bf16.mxu1 %v2012_v33 }
 0x8bc   :  { %2015 = vmatpush3.bf16.msra.mxu1 %v2012_v33 }
 0x986   :  { %v1911_v19 = vpop.f32.mrb[6].mxu0 }
 0x987   :  { %v1043_v20 = vadd.f32 %v1911_v19, %v1754_v18  ;;  %v1037_v21 = vpop.f32.mrb[7].mxu0  ;;  %v1328_v19 = vld [vmem:[#allocation7 + $0xf0] sm:$0xff] }
 0x988   :  { %v1038_v22 = vadd.f32 %v1754_v18, %v1037_v21  ;;  %v1327_v18 = vld [vmem:[#allocation7 + $0xe8] sm:$0xff]  ;;  %v1329_v21 = vld [vmem:[#allocation7 + $0xf8] sm:$0xff] }
 0x989   :  { %v1049_v23 = vsel %vm170_vm4, %v1043_v20, 0.0  ;;  %v1055_v24 = vmul.f32 %v1043_v20, %v1043_v20 }
 0x98a   :  { %1050 = vadd.xlane.f32.xlu1 %v1049_v23  ;;  %v1046_v25 = vsel %vm170_vm4, %v1038_v22, 0.0  ;;  %v1054_v26 = vmul.f32 %v1038_v22, %v1038_v22  ;;  %v1246_v23 = vld [vmem:[#allocation7 + $0x100] sm:$0xff] }
 0x98b   :  { %1047 = vadd.xlane.f32.xlu0 %v1046_v25  ;;  %v1059_v27 = vsel %vm170_vm4, %v1055_v24, 0.0  ;;  %v1247_v24 = vld [vmem:[#allocation7 + $0x108] sm:$0xff] }
 0x98c   :  { %v1056_v28 = vsel %vm170_vm4, %v1054_v26, 0.0  ;;  %v2017_v25 = vpack.c.bf16 %v1247_v24, %v1246_v23  ;;  %v1248_v26 = vld [vmem:[#allocation7 + $0x110] sm:$0xff] }
 0x98d   :  { %v1767_v23 = vld [vmem:[#allocation8 + $0x17] ss:$0 sm:$0xff] }
 0x98e   :  { %1060 = vadd.xlane.f32.xlu1 %v1059_v27  ;;  %v1249_v27 = vld [vmem:[#allocation7 + $0x118] sm:$0xff]  ;;  %2018 = vmatpush3.bf16.msra.mxu0 %v2017_v25 }
 0x98f   :  { %1057 = vadd.xlane.f32.xlu0 %v1056_v28  ;;  %v2020_v28 = vpack.c.bf16 %v1249_v27, %v1248_v26  ;;  %2019 = vmatprep.subr.bf16.mxu0 %v2219_v61 }
 0x992   :  { %2021 = vmatpush3.bf16.msra.mxu0 %v2020_v28 }
 0xa17   :  { %v1051_v34 = vpop.xlane.xlu1 %1050 }
 0xa18   :  { %v1053_v35 = vmul.f32 0.03125, %v1051_v34  ;;  %v1048_v36 = vpop.xlane.xlu0 %1047 }
 0xa19   :  { %v1052_v37 = vmul.f32 0.03125, %v1048_v36 }
 0xa1a   :  { %v1065_v39 = vmul.f32 %v1053_v35, %v1053_v35  ;;  %v1071_v46 = vsub.f32 %v1043_v20, %v1053_v35  ;;  %v2022_v20 = vpack.c.bf16 %v1327_v18, %v1326_v15 }
 0xa1b   :  { %v1061_v38 = vpop.xlane.xlu1 %1060  ;;  %v1064_v42 = vmul.f32 %v1052_v37, %v1052_v37  ;;  %v1070_v52 = vsub.f32 %v1038_v22, %v1052_v37  ;;  %v2026_v22 = vpack.c.bf16 %v1329_v21, %v1328_v19 }
 0xa1c   :  { %v1063_v40 = vmul.f32 0.03125, %v1061_v38  ;;  %v1058_v41 = vpop.xlane.xlu0 %1057  ;;  %2023 = vmatprep.subr.bf16.mxu1 %v2022_v20 }
 0xa1d   :  { %v1062_v43 = vmul.f32 0.03125, %v1058_v41 }
 0xa1e   :  { %v1067_v44 = vsub.f32 %v1063_v40, %v1065_v39 }
 0xa1f   :  { %v1066_v50 = vsub.f32 %v1062_v43, %v1064_v42 }
 0xa20   :  { %v1069_v51 = vmax.f32 %v1067_v44, 0.0 }
 0xa21   :  { %v1068_v45 = vmax.f32 %v1066_v50, 0.0 }
 0xa22   :  { %v1073_v47 = vadd.f32 1e-05, %v1069_v51  ;;  %v1762_v51 = vld [vmem:[#allocation8 + $0x15] ss:$0 sm:$0xff] }
 0xa23   :  { %v1072_v49 = vadd.f32 1e-05, %v1068_v45 }
 0xa24   :  { %2074 = vrsqrt.f32 %v1073_v47 }
 0xa25   :  { %2076 = vrsqrt.f32 %v1072_v49  ;;  %v1763_v49 = vld [vmem:[#allocation8 + $0x16] ss:$0 sm:$0xff] }
 0xa2e   :  { %v2075_v48 = vpop.eup %2074 }
 0xa2f   :  { %v2077_v54 = vpop.eup %2076  ;;  %v1077_v55 = vmul.f32 %v2075_v48, %v1071_v46 }
 0xa30   :  { %v1076_v58 = vmul.f32 %v2077_v54, %v1070_v52 }
 0xa31   :  { %v1083_v60 = vmul.f32 %v1757_v53, %v1077_v55 }
 0xa32   :  { %v1082_v63 = vmul.f32 %v1757_v53, %v1076_v58 }
 0xa33   :  { %v1089_v0 = vadd.f32 %v1758_v57, %v1083_v60 }
 0xa34   :  { %v1088_v1 = vadd.f32 %v1758_v57, %v1082_v63 }
 0xa35   :  { %v1091_v3 = vmax.f32 %v1089_v0, 0.0 }
 0xa36   :  { %v1090_v2 = vmax.f32 %v1088_v1, 0.0 }
 0xa38   :  { %1920 = vmatprep.mubr.msk.f32.mxu1 %vm170_vm4, %v1090_v2 }
 0xa39   :  { %1921 = vmatmul.mubr.msk.f32.vlgmr.msra.gmra.mrb[6].mxu1 %vm170_vm4, %v1091_v3 }
 0xa3a   :  { %2025 = vmatpush3.bf16.msra.mxu1 %v2022_v20 }
 0xa3b   :  { %2027 = vmatprep.subr.bf16.mxu1 %v2026_v22 }
 0xa3e   :  { %2029 = vmatpush3.bf16.msra.mxu1 %v2026_v22 }
 0xb0c   :  { %v1922_v5 = vpop.f32.mrb[6].mxu1 }
 0xb0d   :  { %v1182_v6 = vadd.f32 %v1922_v5, %v1759_v4  ;;  %v1176_v7 = vpop.f32.mrb[7].mxu1 }
 0xb0e   :  { %v1177_v8 = vadd.f32 %v1759_v4, %v1176_v7 }
 0xb0f   :  { %v1188_v9 = vsel %vm170_vm4, %v1182_v6, 0.0  ;;  %v1194_v10 = vmul.f32 %v1182_v6, %v1182_v6 }
 0xb10   :  { %1189 = vadd.xlane.f32.xlu1 %v1188_v9  ;;  %v1185_v11 = vsel %vm170_vm4, %v1177_v8, 0.0  ;;  %v1193_v12 = vmul.f32 %v1177_v8, %v1177_v8 }
 0xb11   :  { %1186 = vadd.xlane.f32.xlu0 %v1185_v11  ;;  %v1198_v13 = vsel %vm170_vm4, %v1194_v10, 0.0 }
 0xb12   :  { %v1195_v14 = vsel %vm170_vm4, %v1193_v12, 0.0 }
 0xb14   :  { %1199 = vadd.xlane.f32.xlu1 %v1198_v13 }
 0xb15   :  { %1196 = vadd.xlane.f32.xlu0 %v1195_v14 }
 0xb9d   :  { %v1190_v62 = vpop.xlane.xlu1 %1189 }
 0xb9e   :  { %v1192_v29 = vmul.f32 0.03125, %v1190_v62  ;;  %v1187_v30 = vpop.xlane.xlu0 %1186 }
 0xb9f   :  { %v1191_v31 = vmul.f32 0.03125, %v1187_v30 }
 0xba0   :  { %v1204_v33 = vmul.f32 %v1192_v29, %v1192_v29  ;;  %v1210_v61 = vsub.f32 %v1182_v6, %v1192_v29 }
 0xba1   :  { %v1200_v32 = vpop.xlane.xlu1 %1199  ;;  %v1203_v36 = vmul.f32 %v1191_v31, %v1191_v31  ;;  %v1209_v50 = vsub.f32 %v1177_v8, %v1191_v31 }
 0xba2   :  { %v1202_v34 = vmul.f32 0.03125, %v1200_v32  ;;  %v1197_v35 = vpop.xlane.xlu0 %1196 }
 0xba3   :  { %v1201_v37 = vmul.f32 0.03125, %v1197_v35 }
 0xba4   :  { %v1206_v38 = vsub.f32 %v1202_v34, %v1204_v33  ;;  %v1502_v33 = vld [vmem:[#allocation7 + $0x120] sm:$0xff]  ;;  %v1504_v34 = vld [vmem:[#allocation7 + $0x130] sm:$0xff] }
 0xba5   :  { %v1205_v39 = vsub.f32 %v1201_v37, %v1203_v36  ;;  %v1505_v36 = vld [vmem:[#allocation7 + $0x138] sm:$0xff] }
 0xba6   :  { %v1208_v40 = vmax.f32 %v1206_v38, 0.0  ;;  %v2034_v37 = vpack.c.bf16 %v1505_v36, %v1504_v34  ;;  %v1773_v36 = vld [vmem:[#allocation8 + $0x1b] ss:$0 sm:$0xff] }
 0xba7   :  { %v1207_v41 = vmax.f32 %v1205_v39, 0.0 }
 0xba8   :  { %v1212_v42 = vadd.f32 1e-05, %v1208_v40 }
 0xba9   :  { %v1211_v43 = vadd.f32 1e-05, %v1207_v41 }
 0xbaa   :  { %2078 = vrsqrt.f32 %v1212_v42 }
 0xbab   :  { %2080 = vrsqrt.f32 %v1211_v43 }
 0xbb4   :  { %v2079_v44 = vpop.eup %2078 }
 0xbb5   :  { %v2081_v45 = vpop.eup %2080  ;;  %v1216_v47 = vmul.f32 %v2079_v44, %v1210_v61 }
 0xbb6   :  { %v1215_v46 = vmul.f32 %v2081_v45, %v1209_v50 }
 0xbb7   :  { %v1222_v48 = vmul.f32 %v1762_v51, %v1216_v47 }
 0xbb8   :  { %v1221_v52 = vmul.f32 %v1762_v51, %v1215_v46 }
 0xbb9   :  { %v1228_v53 = vadd.f32 %v1763_v49, %v1222_v48 }
 0xbba   :  { %v1227_v54 = vadd.f32 %v1763_v49, %v1221_v52 }
 0xbbb   :  { %v1230_v55 = vmax.f32 %v1228_v53, 0.0 }
 0xbbc   :  { %v1229_v57 = vmax.f32 %v1227_v54, 0.0 }
 0xbbd   :  { %v1238_v58 = vsel %vm170_vm4, %v1230_v55, -inf }
 0xbbe   :  { %v1231_v60 = vsel %vm170_vm4, %v1229_v57, -inf  ;;  %v1239_v63 = vrot.slane %v1238_v58, 4  ;;  %1942 = vmatprep.mubr.msk.f32.mxu1 %vm170_vm4, %v1229_v57 }
 0xbbf   :  { %v1232_v0 = vrot.slane %v1231_v60, 4  ;;  %1943 = vmatmul.mubr.msk.f32.vlgmr.msra.gmra.mrb[8].mxu1 %vm170_vm4, %v1230_v55  ;;  %v1768_v55 = vld [vmem:[#allocation8 + $0x18] ss:$0 sm:$0xff] }
 0xbc0   :  { %v1240_v1 = vmax.f32 %v1238_v58, %v1239_v63  ;;  %v1769_v63 = vld [vmem:[#allocation8 + $0x19] ss:$0 sm:$0xff] }
 0xbc1   :  { %v1233_v2 = vmax.f32 %v1231_v60, %v1232_v0 }
 0xbc2   :  { %v1241_v3 = vrot.slane %v1240_v1, 2 }
 0xbc3   :  { %v1234_v4 = vrot.slane %v1233_v2, 2 }
 0xbc4   :  { %v1242_v5 = vmax.f32 %v1240_v1, %v1241_v3 }
 0xbc5   :  { %v1235_v6 = vmax.f32 %v1233_v2, %v1234_v4 }
 0xbc6   :  { %v1243_v7 = vrot.slane %v1242_v5, 1 }
 0xbc7   :  { %v1236_v8 = vrot.slane %v1235_v6, 1 }
 0xbc8   :  { %v1244_v9 = vmax.f32 %v1242_v5, %v1243_v7  ;;  %v1770_v7 = vld [vmem:[#allocation8 + $0x1a] ss:$0 sm:$0xff] }
 0xbc9   :  { %v1237_v10 = vmax.f32 %v1235_v6, %v1236_v8 }
 0xbcb   :  { %v1252_v11 = vsel %vm516_vm6, %v1244_v9, %v1237_v10 }
 0xbcc   :  { %1932 = vmatmul.mubr.msk.f32.vlgmr.msra.gmra.mrb[8].mxu0 %vm170_vm4, %v1252_v11 }
 0xc92   :  { %v1944_v12 = vpop.f32.mrb[8].mxu1 }
 0xc93   :  { %v1402_v13 = vpop.f32.mrb[9].mxu1 }
 0xc9f   :  { %v1321_v14 = vpop.f32.mrb[8].mxu0 }
 0xca0   :  { %v1418_v15 = vrot.slane %v1321_v14, %v2359_v56  ;;  %v1933_v18 = vpop.f32.mrb[9].mxu0 }
 0xca2   :  { %v1419_v19 = vcombine.high %v1418_v15, %v1418_v15  ;;  %v1426_v20 = vrot.slane %v1418_v15, %v2359_v56 }
 0xca4   :  { %v1433_v21 = vrot.slane %v1419_v19, %v2359_v56  ;;  %v1437_v22 = vrot.slane %v1426_v20, %v2362_v59 }
 0xca6   :  { %v1441_v24 = vrot.slane %v1433_v21, %v2362_v59  ;;  %v1444_v25 = vadd.f32 %v1437_v22, %v1402_v13  ;;  %v1503_v59 = vld [vmem:[#allocation7 + $0x128] sm:$0xff] }
 0xca7   :  { %v2030_v35 = vpack.c.bf16 %v1503_v59, %v1502_v33 }
 0xca8   :  { %v1451_v26 = vadd.f32 %v1767_v23, %v1444_v25  ;;  %v1445_v27 = vadd.f32 %v1944_v12, %v1441_v24 }
 0xca9   :  { %2031 = vmatprep.subr.bf16.mxu0 %v2030_v35 }
 0xcaa   :  { %v1455_v28 = vsel %vm170_vm4, %v1451_v26, 0.0  ;;  %v1452_v62 = vadd.f32 %v1767_v23, %v1445_v27  ;;  %v1463_v29 = vmul.f32 %v1451_v26, %v1451_v26  ;;  %2033 = vmatpush3.bf16.msra.mxu0 %v2030_v35 }
 0xcab   :  { %1456 = vadd.xlane.f32.xlu0 %v1455_v28  ;;  %2035 = vmatprep.subr.bf16.mxu0 %v2034_v37 }
 0xcac   :  { %v1458_v30 = vsel %vm170_vm4, %v1452_v62, 0.0  ;;  %v1464_v31 = vmul.f32 %v1452_v62, %v1452_v62  ;;  %v1465_v32 = vsel %vm170_vm4, %v1463_v29, 0.0 }
 0xcad   :  { %1459 = vadd.xlane.f32.xlu1 %v1458_v30 }
 0xcae   :  { %v1468_v56 = vsel %vm170_vm4, %v1464_v31, 0.0  ;;  %2037 = vmatpush3.bf16.msra.mxu0 %v2034_v37 }
 0xcaf   :  { %1466 = vadd.xlane.f32.xlu0 %v1465_v32 }
 0xcb1   :  { %1469 = vadd.xlane.f32.xlu1 %v1468_v56 }
 0xd38   :  { %v1457_v38 = vpop.xlane.xlu0 %1456 }
 0xd39   :  { %v1461_v39 = vmul.f32 0.03125, %v1457_v38 }
 0xd3a   :  { %v1460_v40 = vpop.xlane.xlu1 %1459 }
 0xd3b   :  { %v1462_v41 = vmul.f32 0.03125, %v1460_v40  ;;  %v1473_v43 = vmul.f32 %v1461_v39, %v1461_v39  ;;  %v1479_v53 = vsub.f32 %v1451_v26, %v1461_v39  ;;  %v1774_v39 = vld [vmem:[#allocation8 + $0x1c] ss:$0 sm:$0xff] }
 0xd3c   :  { %v1467_v42 = vpop.xlane.xlu0 %1466 }
 0xd3d   :  { %v1471_v61 = vmul.f32 0.03125, %v1467_v42  ;;  %v1474_v50 = vmul.f32 %v1462_v41, %v1462_v41  ;;  %v1480_v57 = vsub.f32 %v1452_v62, %v1462_v41 }
 0xd3e   :  { %v1470_v44 = vpop.xlane.xlu1 %1469 }
 0xd3f   :  { %v1475_v51 = vsub.f32 %v1471_v61, %v1473_v43  ;;  %v1472_v45 = vmul.f32 0.03125, %v1470_v44 }
 0xd41   :  { %v1477_v47 = vmax.f32 %v1475_v51, 0.0  ;;  %v1476_v49 = vsub.f32 %v1472_v45, %v1474_v50 }
 0xd43   :  { %v1481_v46 = vadd.f32 1e-05, %v1477_v47  ;;  %v1478_v48 = vmax.f32 %v1476_v49, 0.0 }
 0xd45   :  { %2082 = vrsqrt.f32 %v1481_v46  ;;  %v1482_v52 = vadd.f32 1e-05, %v1478_v48 }
 0xd47   :  { %2084 = vrsqrt.f32 %v1482_v52 }
 0xd4f   :  { %v2083_v54 = vpop.eup %2082 }
 0xd50   :  { %v1485_v58 = vmul.f32 %v2083_v54, %v1479_v53 }
 0xd51   :  { %v2085_v60 = vpop.eup %2084 }
 0xd52   :  { %v1486_v0 = vmul.f32 %v2085_v60, %v1480_v57  ;;  %v1491_v1 = vmul.f32 %v1768_v55, %v1485_v58 }
 0xd54   :  { %v1492_v2 = vmul.f32 %v1768_v55, %v1486_v0  ;;  %v1497_v3 = vadd.f32 %v1769_v63, %v1491_v1 }
 0xd56   :  { %v1498_v4 = vadd.f32 %v1769_v63, %v1492_v2  ;;  %v1499_v5 = vmax.f32 %v1497_v3, 0.0 }
 0xd58   :  { %v1500_v6 = vmax.f32 %v1498_v4, 0.0  ;;  %1953 = vmatprep.mubr.msk.f32.mxu0 %vm170_vm4, %v1499_v5 }
 0xd5a   :  { %1954 = vmatmul.mubr.msk.f32.vlgmr.msra.gmra.mrb[10].mxu0 %vm170_vm4, %v1500_v6 }
 0xe2d   :  { %v1955_v8 = vpop.f32.mrb[10].mxu0 }
 0xe2e   :  { %v1591_v9 = vadd.f32 %v1955_v8, %v1770_v7  ;;  %v1585_v10 = vpop.f32.mrb[11].mxu0 }
 0xe2f   :  { %v1586_v11 = vadd.f32 %v1770_v7, %v1585_v10 }
 0xe30   :  { %v1597_v12 = vsel %vm170_vm4, %v1591_v9, 0.0  ;;  %v1603_v13 = vmul.f32 %v1591_v9, %v1591_v9 }
 0xe31   :  { %1598 = vadd.xlane.f32.xlu1 %v1597_v12  ;;  %v1594_v14 = vsel %vm170_vm4, %v1586_v11, 0.0  ;;  %v1602_v15 = vmul.f32 %v1586_v11, %v1586_v11 }
 0xe32   :  { %1595 = vadd.xlane.f32.xlu0 %v1594_v14  ;;  %v1607_v18 = vsel %vm170_vm4, %v1603_v13, 0.0 }
 0xe33   :  { %v1604_v19 = vsel %vm170_vm4, %v1602_v15, 0.0  ;;  %v1776_v15 = vld [vmem:[#allocation8 + $0x1e] ss:$0 sm:$0xff] }
 0xe35   :  { %1608 = vadd.xlane.f32.xlu1 %v1607_v18 }
 0xe36   :  { %1605 = vadd.xlane.f32.xlu0 %v1604_v19 }
 0xebe   :  { %v1599_v20 = vpop.xlane.xlu1 %1598 }
 0xebf   :  { %v1601_v21 = vmul.f32 0.03125, %v1599_v20  ;;  %v1596_v22 = vpop.xlane.xlu0 %1595 }
 0xec0   :  { %v1600_v23 = vmul.f32 0.03125, %v1596_v22 }
 0xec1   :  { %v1613_v25 = vmul.f32 %v1601_v21, %v1601_v21  ;;  %v1619_v59 = vsub.f32 %v1591_v9, %v1601_v21 }
 0xec2   :  { %v1609_v24 = vpop.xlane.xlu1 %1608  ;;  %v1612_v28 = vmul.f32 %v1600_v23, %v1600_v23  ;;  %v1618_v35 = vsub.f32 %v1586_v11, %v1600_v23  ;;  %v1775_v11 = vld [vmem:[#allocation8 + $0x1d] ss:$0 sm:$0xff] }
 0xec3   :  { %v1611_v26 = vmul.f32 0.03125, %v1609_v24  ;;  %v1606_v27 = vpop.xlane.xlu0 %1605 }
 0xec4   :  { %v1610_v62 = vmul.f32 0.03125, %v1606_v27 }
 0xec5   :  { %v1615_v29 = vsub.f32 %v1611_v26, %v1613_v25 }
 0xec6   :  { %v1614_v30 = vsub.f32 %v1610_v62, %v1612_v28 }
 0xec7   :  { %v1617_v31 = vmax.f32 %v1615_v29, 0.0 }
 0xec8   :  { %v1616_v32 = vmax.f32 %v1614_v30, 0.0 }
 0xec9   :  { %v1621_v56 = vadd.f32 1e-05, %v1617_v31 }
 0xeca   :  { %v1620_v33 = vadd.f32 1e-05, %v1616_v32 }
 0xecb   :  { %2086 = vrsqrt.f32 %v1621_v56 }
 0xecc   :  { %2088 = vrsqrt.f32 %v1620_v33 }
 0xed5   :  { %v2087_v34 = vpop.eup %2086 }
 0xed6   :  { %v2089_v37 = vpop.eup %2088  ;;  %v1625_v38 = vmul.f32 %v2087_v34, %v1619_v59 }
 0xed7   :  { %v1624_v40 = vmul.f32 %v2089_v37, %v1618_v35 }
 0xed8   :  { %v1631_v41 = vmul.f32 %v1773_v36, %v1625_v38 }
 0xed9   :  { %v1630_v42 = vmul.f32 %v1773_v36, %v1624_v40 }
 0xeda   :  { %v1637_v43 = vadd.f32 %v1774_v39, %v1631_v41 }
 0xedb   :  { %v1636_v61 = vadd.f32 %v1774_v39, %v1630_v42 }
 0xedc   :  { %v1639_v44 = vmax.f32 %v1637_v43, 0.0 }
 0xedd   :  { %v1638_v50 = vmax.f32 %v1636_v61, 0.0 }
 0xede   :  { %v1641_v51 = vadd.f32 %v1639_v44, %v2389_v17 }
 0xedf   :  { %v1640_v45 = vadd.f32 %v1638_v50, %v2387_v16 }
 0xee0   :  { %v1647_v47 = vsel %vm170_vm4, %v1641_v51, 0.0  ;;  %v1653_v49 = vmul.f32 %v1641_v51, %v1641_v51 }
 0xee1   :  { %1648 = vadd.xlane.f32.xlu1 %v1647_v47  ;;  %v1644_v46 = vsel %vm170_vm4, %v1640_v45, 0.0  ;;  %v1652_v48 = vmul.f32 %v1640_v45, %v1640_v45 }
 0xee2   :  { %1645 = vadd.xlane.f32.xlu0 %v1644_v46  ;;  %v1657_v52 = vsel %vm170_vm4, %v1653_v49, 0.0 }
 0xee3   :  { %v1654_v53 = vsel %vm170_vm4, %v1652_v48, 0.0 }
 0xee5   :  { %1658 = vadd.xlane.f32.xlu1 %v1657_v52 }
 0xee6   :  { %1655 = vadd.xlane.f32.xlu0 %v1654_v53 }
 0xf6e   :  { %v1649_v54 = vpop.xlane.xlu1 %1648 }
 0xf6f   :  { %v1651_v55 = vmul.f32 0.03125, %v1649_v54  ;;  %v1646_v57 = vpop.xlane.xlu0 %1645 }
 0xf70   :  { %v1650_v17 = vmul.f32 0.03125, %v1646_v57 }
 0xf71   :  { %v1663_v16 = vmul.f32 %v1651_v55, %v1651_v55  ;;  %v1669_v8 = vsub.f32 %v1641_v51, %v1651_v55 }
 0xf72   :  { %v1659_v58 = vpop.xlane.xlu1 %1658  ;;  %v1662_v0 = vmul.f32 %v1650_v17, %v1650_v17  ;;  %v1668_v10 = vsub.f32 %v1640_v45, %v1650_v17 }
 0xf73   :  { %v1661_v60 = vmul.f32 0.03125, %v1659_v58  ;;  %v1656_v63 = vpop.xlane.xlu0 %1655 }
 0xf74   :  { %v1660_v1 = vmul.f32 0.03125, %v1656_v63 }
 0xf75   :  { %v1665_v2 = vsub.f32 %v1661_v60, %v1663_v16 }
 0xf76   :  { %v1664_v3 = vsub.f32 %v1660_v1, %v1662_v0 }
 0xf77   :  { %v1667_v4 = vmax.f32 %v1665_v2, 0.0 }
 0xf78   :  { %v1666_v5 = vmax.f32 %v1664_v3, 0.0 }
 0xf79   :  { %v1671_v6 = vadd.f32 1e-05, %v1667_v4 }
 0xf7a   :  { %v1670_v7 = vadd.f32 1e-05, %v1666_v5 }
 0xf7b   :  { %2090 = vrsqrt.f32 %v1671_v6 }
 0xf7c   :  { %2092 = vrsqrt.f32 %v1670_v7 }
 0xf85   :  { %v2091_v9 = vpop.eup %2090 }
 0xf86   :  { %v2093_v12 = vpop.eup %2092  ;;  %v1675_v13 = vmul.f32 %v2091_v9, %v1669_v8 }
 0xf87   :  { %v1674_v14 = vmul.f32 %v2093_v12, %v1668_v10 }
 0xf88   :  { %v1681_v18 = vmul.f32 %v1775_v11, %v1675_v13 }
 0xf89   :  { %v1680_v19 = vmul.f32 %v1775_v11, %v1674_v14 }
 0xf8a   :  { %v1687_v20 = vadd.f32 %v1776_v15, %v1681_v18 }
 0xf8b   :  { %v1686_v21 = vadd.f32 %v1776_v15, %v1680_v19 }
 0xf8c   :  { %v1695_v22 = vsel %vm170_vm4, %v1687_v20, -inf }
 0xf8d   :  { %v1688_v23 = vsel %vm170_vm4, %v1686_v21, -inf  ;;  %v1696_v24 = vrot.slane %v1695_v22, 4 }
 0xf8e   :  { %v1689_v25 = vrot.slane %v1688_v23, 4 }
 0xf8f   :  { %v1697_v26 = vmax.f32 %v1695_v22, %v1696_v24 }
 0xf90   :  { %v1690_v27 = vmax.f32 %v1688_v23, %v1689_v25 }
 0xf91   :  { %v1698_v28 = vrot.slane %v1697_v26, 2 }
 0xf92   :  { %v1691_v62 = vrot.slane %v1690_v27, 2 }
 0xf93   :  { %v1699_v29 = vmax.f32 %v1697_v26, %v1698_v28 }
 0xf94   :  { %v1692_v30 = vmax.f32 %v1690_v27, %v1691_v62 }
 0xf95   :  { %v1700_v31 = vrot.slane %v1699_v29, 1 }
 0xf96   :  { %v1693_v32 = vrot.slane %v1692_v30, 1 }
 0xf97   :  { %v1701_v56 = vmax.f32 %v1699_v29, %v1700_v31 }
 0xf98   :  { %v1694_v33 = vmax.f32 %v1692_v30, %v1693_v32 }
 0xf9a   :  { %v1704_v59 = vsel %vm516_vm6, %v1701_v56, %v1694_v33 }
 0xf9b   :  { %1707 = vst.msk [vmem:[#allocation10] sm:$0x3] %vm1706_vm7, %v1704_v59 }
 0xf9c   :  { %2193 = shalt.err (!%p2190_p8)
}
 0xf9d   :  { %s2194_s13 = scalar_lea.hbm %s2454_s4, 32 }
 0xf9e   :  { %p2195_p9 = scmp.ne.s32.totalorder %s2454_s4, %s2194_s13  ;;  %p2198_p10 = scmp.lt.u32.totalorder %s2194_s13, %s2454_s4 }
 0xfa0   :  { %p2200_p11 = pnand %p2198_p10, %p2195_p9 }
 0xfa2   :  { %2203 = shalt.err (!%p2200_p11)
}
 0xfa3   :  { %1717 = dma.vmem_to_hbm [thread:$0]  %s1715_s27, 32, %s2454_s4, [#allocation4]  }
 0xfa4   :  { %2210 = dma.done.wait [#allocation4], 32  }
 0xfa5   :  { %2211 = vsyncadd [#allocation4], 4294967264 }
 0xfa6   :  { %1721 = vsyncpa [#allocation3], 1 }
 0xfa7   :  { %1722 = vsyncpa [#allocation6], 1 }
 0xfa8   :  { %1723 = vsyncpa [#allocation9], 1 }
 0xfa9   :  { %1724 = vsyncpa [#allocation4], 1 }

</bundles_post_ra>
